<compile_context>
chip_gen: v7x
topology: tpu7x:2x2x1
jax: 0.10.0
libtpu: 0.0.40
codegen_flags: <defaults>
</compile_context>

<pallas_src>
import functools
import math

import jax
import jax.numpy as jnp
from jax import lax
from jax.experimental import pallas as pl
from jax.experimental.pallas import tpu as pltpu

NUM_GROUPS = 32
EPS = 1e-5


def _pick_q_tile(hw):
    """Largest multiple-of-8 divisor of HW up to 512, else the full HW."""
    if hw <= 512:
        return hw
    for t in range(512, 7, -8):
        if hw % t == 0:
            return t
    # TODO(synk): ragged HW on the query side falls back to a single q tile.
    return hw


def _pick_kv_tile(hw):
    """Returns (kv_tile, padded_kv_length). Prefers a lane-dense (multiple of
    128) divisor of HW up to 512; otherwise pads KV to a multiple of 512 and the
    last tile is masked in-kernel (never a full (HW, HW) score matrix)."""
    if hw <= 512:
        return hw, hw
    for t in range(512, 127, -128):
        if hw % t == 0:
            return t, hw
    kv_tile = 512
    n = pl.cdiv(hw, kv_tile)
    return kv_tile, n * kv_tile


def _vmem_limit_bytes(hw, c, q_tile, kv_tile, kv_pad_len):
    """Explicit scoped-VMEM request when the compiler default would be too
    small; None for small shapes. Capped at ~80% of physical VMEM."""
    weights = (4 * c * c) * 2 + (2 * c + 3 * c + c) * 4 + c * c * 4
    x_slab = 2 * hw * c * 4                       # x input (double buffered)
    kv_scratch = 2 * kv_pad_len * c * 2 + 2 * c * 4
    out_buf = 2 * q_tile * c * 4
    temps = max(hw * c * 2 + hw * c * 4,          # q==0 step: bf16 h + one f32 proj
                2 * q_tile * kv_tile * 4 + 2 * q_tile * c * 4)
    est = weights + x_slab + kv_scratch + out_buf + temps
    if est <= 12 * 1024 * 1024:
        return None
    try:
        cap = pltpu.get_tpu_info().vmem_capacity_bytes
    except Exception:
        cap = 64 * 1024 * 1024
    return min(int(1.5 * est), int(0.8 * cap))


def _attention_block_kernel(
    x_ref,      # (1, HW, C)  f32   input tokens for this batch element (full slab)
    gn_ref,     # (2, C)      f32   row0 = GroupNorm gamma, row1 = beta
    pavg_ref,   # (C, C)      f32   block-diagonal group-averaging matrix (1/n folded)
    wqkv_ref,   # (C, 3C)     bf16  fused q|k|v weight (C_in, 3*C_out)
    bqkv_ref,   # (1, 3C)     f32   fused q|k|v bias
    wo_ref,     # (C, C)      bf16  output projection weight
    bo_ref,     # (1, C)      f32   output projection bias
    o_ref,      # (1, q_tile, C) f32 output tile
    stat_ref,   # (2, C)      f32   scratch: row0 = scale, row1 = shift
    k_ref,      # (kv_pad, C) bf16  scratch: keys for the whole batch element
    v_ref,      # (kv_pad, C) bf16  scratch: values
    *,
    kv_tile,
):
    hw = x_ref.shape[1]
    c = x_ref.shape[2]
    q_tile = o_ref.shape[1]
    kv_pad_len = k_ref.shape[0]
    num_kv_tiles = kv_pad_len // kv_tile
    pad = kv_pad_len - hw

    q_idx = pl.program_id(1)

    # ---- once per batch element: GroupNorm stats + K/V projections -> scratch ----
    @pl.when(q_idx == 0)
    def _():
        x = x_ref[0]                                           # (HW, C) f32
        # Two-pass GroupNorm stats (no E[x^2]-E[x]^2 cancellation), f32.
        ch_sum = jnp.sum(x, axis=0, keepdims=True)             # (1, C)
        mean_c = jnp.dot(ch_sum, pavg_ref[...],
                         preferred_element_type=jnp.float32)   # (1, C)
        xc = x - mean_c
        ch_sq = jnp.sum(xc * xc, axis=0, keepdims=True)        # (1, C)
        var_c = jnp.dot(ch_sq, pavg_ref[...],
                        preferred_element_type=jnp.float32)    # (1, C)
        inv_std = lax.rsqrt(var_c + EPS)

        gamma = gn_ref[0:1, :]
        beta = gn_ref[1:2, :]
        scale = inv_std * gamma                                # (1, C)
        shift = beta - mean_c * scale                          # (1, C)
        stat_ref[0:1, :] = scale
        stat_ref[1:2, :] = shift

        # Normalized activations exist only as bf16 (no separate f32 `h`,
        # no (HW, 3C) f32 qkv slab): two narrow bf16 matmuls into scratch.
        h_bf = (x * scale + shift).astype(jnp.bfloat16)        # (HW, C)
        wk = wqkv_ref[:, c:2 * c]
        wv = wqkv_ref[:, 2 * c:3 * c]
        bk = bqkv_ref[:, c:2 * c]
        bv = bqkv_ref[:, 2 * c:3 * c]
        k_ref[0:hw, :] = (jnp.dot(h_bf, wk, preferred_element_type=jnp.float32)
                          + bk).astype(jnp.bfloat16)
        v_ref[0:hw, :] = (jnp.dot(h_bf, wv, preferred_element_type=jnp.float32)
                          + bv).astype(jnp.bfloat16)
        if pad > 0:
            # Zero the pad rows so the masked PV matmul never touches garbage.
            k_ref[hw:, :] = jnp.zeros((pad, c), jnp.bfloat16)
            v_ref[hw:, :] = jnp.zeros((pad, c), jnp.bfloat16)

    # ---- per q-tile: Q projection + attention + out projection + residual ----
    scale = stat_ref[0:1, :]
    shift = stat_ref[1:2, :]

    row0 = pl.multiple_of(q_idx * q_tile, q_tile)
    x_q = x_ref[0, pl.ds(row0, q_tile), :]                     # (q_tile, C) f32
    hq_bf = (x_q * scale + shift).astype(jnp.bfloat16)

    wq = wqkv_ref[:, 0:c]
    bq = bqkv_ref[:, 0:c]
    attn_scale = jnp.float32(1.0 / math.sqrt(c))               # fold softmax scale into q
    q = ((jnp.dot(hq_bf, wq, preferred_element_type=jnp.float32) + bq)
         * attn_scale).astype(jnp.bfloat16)                    # (q_tile, C)

    qk_dims = (((1,), (1,)), ((), ()))                         # q @ k^T, no explicit transpose

    if num_kv_tiles == 1:
        # Single-pass softmax; normalization deferred until after the PV matmul.
        s = lax.dot_general(q, k_ref[...], qk_dims,
                            preferred_element_type=jnp.float32)
        if pad > 0:
            col = lax.broadcasted_iota(jnp.int32, s.shape, 1)
            s = jnp.where(col < hw, s, jnp.float32(-jnp.inf))
        m = jnp.max(s, axis=-1, keepdims=True)
        e = jnp.exp(s - m)
        denom = jnp.sum(e, axis=-1, keepdims=True)
        a = jnp.dot(e.astype(jnp.bfloat16), v_ref[...],
                    preferred_element_type=jnp.float32)        # (q_tile, C)
        a = a * pl.reciprocal(denom, approx=True)
    else:
        # Flash-style online softmax over KV tiles; only a (q_tile, kv_tile)
        # score tile is live at a time.
        def tile_attn(t, carry, *, masked):
            m_prev, l_prev, acc_prev = carry
            start = pl.multiple_of(t * kv_tile, kv_tile)
            k_t = k_ref[pl.ds(start, kv_tile), :]
            v_t = v_ref[pl.ds(start, kv_tile), :]
            s = lax.dot_general(q, k_t, qk_dims,
                                preferred_element_type=jnp.float32)
            if masked:
                col = start + lax.broadcasted_iota(jnp.int32, s.shape, 1)
                s = jnp.where(col < hw, s, jnp.float32(-jnp.inf))
            m_new = jnp.maximum(m_prev, jnp.max(s, axis=-1, keepdims=True))
            alpha = jnp.exp(m_prev - m_new)
            p = jnp.exp(s - m_new)
            l_new = alpha * l_prev + jnp.sum(p, axis=-1, keepdims=True)
            acc_new = alpha * acc_prev + jnp.dot(
                p.astype(jnp.bfloat16), v_t, preferred_element_type=jnp.float32)
            return m_new, l_new, acc_new

        m0 = jnp.full((q_tile, 1), -jnp.inf, jnp.float32)
        l0 = jnp.zeros((q_tile, 1), jnp.float32)
        acc0 = jnp.zeros((q_tile, c), jnp.float32)
        n_full = num_kv_tiles - 1 if pad > 0 else num_kv_tiles
        carry = lax.fori_loop(
            0, n_full, functools.partial(tile_attn, masked=False),
            (m0, l0, acc0), unroll=(n_full <= 8))
        if pad > 0:
            carry = tile_attn(num_kv_tiles - 1, carry, masked=True)
        _, l_f, acc = carry
        a = acc * pl.reciprocal(l_f, approx=True)               # (q_tile, C)

    out = jnp.dot(a.astype(jnp.bfloat16), wo_ref[...],
                  preferred_element_type=jnp.float32) + bo_ref[...]
    o_ref[0] = x_q + out


def attention_block(x_nchw, params):
    """x_nchw: (B, C, H, W) float32. Returns (B, C, H, W) float32."""
    B, C, H, W = x_nchw.shape
    HW = H * W
    assert C % NUM_GROUPS == 0, "GroupNorm(32, C) requires C % 32 == 0"

    # NCHW -> (B, HW, C).
    # TODO(synk): in a full network keep activations NHWC end-to-end so these
    # HBM-round-trip transposes around the kernel disappear.
    x_tok = jnp.transpose(x_nchw, (0, 2, 3, 1)).reshape(B, HW, C)

    # Block-diagonal group-averaging matrix with 1/n folded in: one M=1 matmul
    # per GroupNorm statistic and one fewer DMA than grp + grp^T.
    cpg = C // NUM_GROUPS
    grp = (jnp.arange(C)[:, None] // cpg == jnp.arange(NUM_GROUPS)[None, :]
           ).astype(jnp.float32)
    p_avg = (grp @ grp.T) / jnp.float32(HW * cpg)                                # (C, C)

    # Pack parameters: gamma/beta -> (2, C); q|k|v weights -> (C, 3C) bf16; biases fused.
    gn = jnp.concatenate([params["gamma"], params["beta"]], axis=0)              # (2, C)
    wqkv = jnp.concatenate([params["wq"], params["wk"], params["wv"]],
                           axis=1).astype(jnp.bfloat16)                          # (C, 3C)
    bqkv = jnp.concatenate([params["bq"], params["bk"], params["bv"]], axis=1)   # (1, 3C)
    wo = params["wo"].astype(jnp.bfloat16)
    bo = params["bo"]

    q_tile = _pick_q_tile(HW)
    kv_tile, kv_pad_len = _pick_kv_tile(HW)
    num_q_tiles = HW // q_tile

    # Grid-invariant inputs: constant index_map -> single-buffered.
    def const_spec(shape):
        return pl.BlockSpec(shape, lambda b, qi: (0,) * len(shape),
                            pipeline_mode=pl.Buffered(1))

    flops = 2 * B * (4 * HW * C * C + 2 * HW * HW * C)
    bytes_accessed = (2 * B * HW * C * 4          # x in + out (f32)
                      + 4 * C * C * 2             # bf16 weights
                      + C * C * 4                 # group-averaging matrix
                      + (3 * C + C + 2 * C) * 4)  # biases + gamma/beta
    cost = pl.CostEstimate(flops=flops, transcendentals=B * HW * HW,
                           bytes_accessed=bytes_accessed)

    out_tok = pl.pallas_call(
        functools.partial(_attention_block_kernel, kv_tile=kv_tile),
        out_shape=jax.ShapeDtypeStruct((B, HW, C), jnp.float32),
        grid_spec=pltpu.PrefetchScalarGridSpec(
            num_scalar_prefetch=0,
            grid=(B, num_q_tiles),
            in_specs=[
                # Full per-batch slab; constant across the q axis -> fetched once per b.
                # TODO(synk): for very large HW*C a two-kernel split (GN+KV, then
                # attention) would avoid keeping the full x slab resident.
                pl.BlockSpec((1, HW, C), lambda b, qi: (b, 0, 0)),
                const_spec((2, C)),                              # gamma/beta
                const_spec((C, C)),                              # group-averaging matrix
                const_spec((C, 3 * C)),                          # fused qkv weight (bf16)
                const_spec((1, 3 * C)),                          # fused qkv bias
                const_spec((C, C)),                              # out weight (bf16)
                const_spec((1, C)),                              # out bias
            ],
            out_specs=pl.BlockSpec((1, q_tile, C), lambda b, qi: (b, qi, 0)),
            scratch_shapes=[
                pltpu.VMEM((2, C), jnp.float32),                 # GroupNorm scale/shift
                pltpu.VMEM((kv_pad_len, C), jnp.bfloat16),       # keys (persist across q)
                pltpu.VMEM((kv_pad_len, C), jnp.bfloat16),       # values
            ],
        ),
        compiler_params=pltpu.CompilerParams(
            dimension_semantics=("parallel", "arbitrary"),
            vmem_limit_bytes=_vmem_limit_bytes(HW, C, q_tile, kv_tile, kv_pad_len)),
        cost_estimate=cost,
    )(x_tok, gn, p_avg, wqkv, bqkv, wo, bo)

    # (B, HW, C) -> NCHW
    return jnp.transpose(out_tok.reshape(B, H, W, C), (0, 3, 1, 2))


def attention_block_ref(x_nchw, params):
    """Pure-JAX f32 reference mirroring the PyTorch forward."""
    B, C, H, W = x_nchw.shape
    HW = H * W
    cpg = C // NUM_GROUPS
    x = jnp.transpose(x_nchw, (0, 2, 3, 1)).reshape(B, HW, C)

    xg = x.reshape(B, HW, NUM_GROUPS, cpg)
    mean = jnp.mean(xg, axis=(1, 3), keepdims=True)
    var = jnp.mean((xg - mean) ** 2, axis=(1, 3), keepdims=True)
    h = ((xg - mean) / jnp.sqrt(var + EPS)).reshape(B, HW, C)
    h = h * params["gamma"] + params["beta"]

    q = h @ params["wq"] + params["bq"]
    k = h @ params["wk"] + params["bk"]
    v = h @ params["wv"] + params["bv"]
    w = jnp.einsum("bqc,bkc->bqk", q, k) * (C ** -0.5)
    w = jax.nn.softmax(w, axis=-1)
    a = jnp.einsum("bqk,bkc->bqc", w, v)
    o = a @ params["wo"] + params["bo"]
    out = x + o
    return jnp.transpose(out.reshape(B, H, W, C), (0, 3, 1, 2))


def init_params(key, C):
    """Deterministic synthetic parameters (not a checkpoint load).
    Conv2d 1x1 weights are stored as (C_in, C_out) matrices."""
    ks = jax.random.split(key, 10)
    scale = 1.0 / math.sqrt(C)
    return {
        "gamma": 1.0 + 0.1 * jax.random.normal(ks[0], (1, C), jnp.float32),
        "beta": 0.1 * jax.random.normal(ks[1], (1, C), jnp.float32),
        "wq": scale * jax.random.normal(ks[2], (C, C), jnp.float32),
        "bq": 0.05 * jax.random.normal(ks[3], (1, C), jnp.float32),
        "wk": scale * jax.random.normal(ks[4], (C, C), jnp.float32),
        "bk": 0.05 * jax.random.normal(ks[5], (1, C), jnp.float32),
        "wv": scale * jax.random.normal(ks[6], (C, C), jnp.float32),
        "bv": 0.05 * jax.random.normal(ks[7], (1, C), jnp.float32),
        "wo": scale * jax.random.normal(ks[8], (C, C), jnp.float32),
        "bo": 0.05 * jax.random.normal(ks[9], (1, C), jnp.float32),
    }


if __name__ == "__main__":
    key = jax.random.PRNGKey(0)
    kx, kp = jax.random.split(key)

    # GroupNorm(32, C) => C divisible by 32; C=128 keeps the channel axis lane-dense.
    B, C, H, W = 2, 128, 8, 8
    x = jax.random.normal(kx, (B, C, H, W), jnp.float32)
    params = init_params(kp, C)

    out = attention_block(x, params)
    out = jax.block_until_ready(out)

    ref = attention_block_ref(x, params)
    assert out.shape == (B, C, H, W)
    # bf16 matmul operands + approx reciprocal => compare against the f32
    # reference with a correspondingly looser tolerance.
    assert jnp.allclose(out, ref, atol=3e-2, rtol=3e-2), (
        "mismatch vs reference: max abs err "
        f"{float(jnp.max(jnp.abs(out - ref)))}")

    print("KERNEL_OK")
</pallas_src>

<mosaic_0001>
module attributes {stable_mosaic.version = 11 : i64} {
  func.func @_attention_block_kernel(%arg0: i32, %arg1: i32, %arg2: memref<1x64x128xf32, #tpu.memory_space<vmem>>, %arg3: memref<2x128xf32, #tpu.memory_space<vmem>>, %arg4: memref<128x128xf32, #tpu.memory_space<vmem>>, %arg5: memref<128x384xbf16, #tpu.memory_space<vmem>>, %arg6: memref<1x384xf32, #tpu.memory_space<vmem>>, %arg7: memref<128x128xbf16, #tpu.memory_space<vmem>>, %arg8: memref<1x128xf32, #tpu.memory_space<vmem>>, %arg9: memref<1x64x128xf32, #tpu.memory_space<vmem>>, %arg10: memref<2x128xf32, #tpu.memory_space<vmem>>, %arg11: memref<64x128xbf16, #tpu.memory_space<vmem>>, %arg12: memref<64x128xbf16, #tpu.memory_space<vmem>>) attributes {dimension_semantics = [#tpu.dimension_semantics<parallel>, #tpu.dimension_semantics<arbitrary>], iteration_bounds = array<i64: 2, 1>, scalar_prefetch = 0 : i64, scratch_operands = 3 : i64, tpu.core_type = #tpu.core_type<tc>, window_params = [{transform_indices = @transform_0, window_bounds = array<i64: 1, 64, 128>}, {pipeline_mode = #tpu.pipeline_mode<synchronous>, transform_indices = @transform_1, window_bounds = array<i64: 2, 128>}, {pipeline_mode = #tpu.pipeline_mode<synchronous>, transform_indices = @transform_2, window_bounds = array<i64: 128, 128>}, {pipeline_mode = #tpu.pipeline_mode<synchronous>, transform_indices = @transform_3, window_bounds = array<i64: 128, 384>}, {pipeline_mode = #tpu.pipeline_mode<synchronous>, transform_indices = @transform_4, window_bounds = array<i64: 1, 384>}, {pipeline_mode = #tpu.pipeline_mode<synchronous>, transform_indices = @transform_5, window_bounds = array<i64: 128, 128>}, {pipeline_mode = #tpu.pipeline_mode<synchronous>, transform_indices = @transform_6, window_bounds = array<i64: 1, 128>}, {transform_indices = @transform_7, window_bounds = array<i64: 1, 64, 128>}]} {
    %c0_i32 = arith.constant 0 : i32
    %0 = arith.cmpi eq, %arg1, %c0_i32 : i32
    %1 = arith.extui %0 : i1 to i32
    %c0_i32_0 = arith.constant 0 : i32
    %2 = arith.cmpi ne, %1, %c0_i32_0 : i32
    scf.if %2 {
      %c0_26 = arith.constant 0 : index
      %c0_27 = arith.constant 0 : index
      %c0_28 = arith.constant 0 : index
      %48 = vector.load %arg2[%c0_26, %c0_27, %c0_28] : memref<1x64x128xf32, #tpu.memory_space<vmem>>, vector<1x64x128xf32>
      %49 = vector.shape_cast %48 : vector<1x64x128xf32> to vector<64x128xf32>
      %cst_29 = arith.constant dense<0.000000e+00> : vector<128xf32>
      %50 = vector.multi_reduction <add>, %49, %cst_29 [0] : vector<64x128xf32> to vector<128xf32>
      %51 = vector.shape_cast %50 : vector<128xf32> to vector<1x128xf32>
      %c0_30 = arith.constant 0 : index
      %c0_31 = arith.constant 0 : index
      %52 = vector.load %arg4[%c0_30, %c0_31] : memref<128x128xf32, #tpu.memory_space<vmem>>, vector<128x128xf32>
      %cst_32 = arith.constant dense<0.000000e+00> : vector<1x128xf32>
      %53 = tpu.matmul %51, %52, %cst_32 {dimension_numbers = #tpu.dot_dimension_numbers<[1], [0], [0], [1], [0, 0, 1, 1], [], []>} : vector<1x128xf32>, vector<128x128xf32>, vector<1x128xf32> -> vector<1x128xf32>
      %54 = vector.broadcast %53 : vector<1x128xf32> to vector<64x128xf32>
      %55 = arith.subf %49, %54 : vector<64x128xf32>
      %56 = arith.mulf %55, %55 : vector<64x128xf32>
      %cst_33 = arith.constant dense<0.000000e+00> : vector<128xf32>
      %57 = vector.multi_reduction <add>, %56, %cst_33 [0] : vector<64x128xf32> to vector<128xf32>
      %58 = vector.shape_cast %57 : vector<128xf32> to vector<1x128xf32>
      %c0_34 = arith.constant 0 : index
      %c0_35 = arith.constant 0 : index
      %59 = vector.load %arg4[%c0_34, %c0_35] : memref<128x128xf32, #tpu.memory_space<vmem>>, vector<128x128xf32>
      %cst_36 = arith.constant dense<0.000000e+00> : vector<1x128xf32>
      %60 = tpu.matmul %58, %59, %cst_36 {dimension_numbers = #tpu.dot_dimension_numbers<[1], [0], [0], [1], [0, 0, 1, 1], [], []>} : vector<1x128xf32>, vector<128x128xf32>, vector<1x128xf32> -> vector<1x128xf32>
      %cst_37 = arith.constant 9.99999974E-6 : f32
      %61 = vector.broadcast %cst_37 : f32 to vector<1x128xf32>
      %62 = arith.addf %60, %61 : vector<1x128xf32>
      %63 = math.rsqrt %62 : vector<1x128xf32>
      %c0_38 = arith.constant 0 : index
      %c0_39 = arith.constant 0 : index
      %64 = vector.load %arg3[%c0_38, %c0_39] : memref<2x128xf32, #tpu.memory_space<vmem>>, vector<1x128xf32>
      %c1_40 = arith.constant 1 : index
      %c0_41 = arith.constant 0 : index
      %65 = vector.load %arg3[%c1_40, %c0_41] : memref<2x128xf32, #tpu.memory_space<vmem>>, vector<1x128xf32>
      %66 = arith.mulf %63, %64 : vector<1x128xf32>
      %67 = arith.mulf %53, %66 : vector<1x128xf32>
      %68 = arith.subf %65, %67 : vector<1x128xf32>
      %c0_42 = arith.constant 0 : index
      %c0_43 = arith.constant 0 : index
      %69 = vector.load %arg10[%c0_42, %c0_43] : memref<2x128xf32, #tpu.memory_space<vmem>>, vector<1x128xf32>
      tpu.vector_store %arg10[%c0_42, %c0_43], %66 {strides = array<i32>} : memref<2x128xf32, #tpu.memory_space<vmem>>, vector<1x128xf32>,
      %c1_44 = arith.constant 1 : index
      %c0_45 = arith.constant 0 : index
      %70 = vector.load %arg10[%c1_44, %c0_45] : memref<2x128xf32, #tpu.memory_space<vmem>>, vector<1x128xf32>
      tpu.vector_store %arg10[%c1_44, %c0_45], %68 {strides = array<i32>} : memref<2x128xf32, #tpu.memory_space<vmem>>, vector<1x128xf32>,
      %71 = vector.broadcast %66 : vector<1x128xf32> to vector<64x128xf32>
      %72 = arith.mulf %49, %71 : vector<64x128xf32>
      %73 = vector.broadcast %68 : vector<1x128xf32> to vector<64x128xf32>
      %74 = arith.addf %72, %73 : vector<64x128xf32>
      %75 = arith.truncf %74 : vector<64x128xf32> to vector<64x128xbf16>
      %c0_46 = arith.constant 0 : index
      %c128 = arith.constant 128 : index
      %76 = vector.load %arg5[%c0_46, %c128] : memref<128x384xbf16, #tpu.memory_space<vmem>>, vector<128x128xbf16>
      %c0_47 = arith.constant 0 : index
      %c256 = arith.constant 256 : index
      %77 = vector.load %arg5[%c0_47, %c256] : memref<128x384xbf16, #tpu.memory_space<vmem>>, vector<128x128xbf16>
      %c0_48 = arith.constant 0 : index
      %c128_49 = arith.constant 128 : index
      %78 = vector.load %arg6[%c0_48, %c128_49] : memref<1x384xf32, #tpu.memory_space<vmem>>, vector<1x128xf32>
      %c0_50 = arith.constant 0 : index
      %c256_51 = arith.constant 256 : index
      %79 = vector.load %arg6[%c0_50, %c256_51] : memref<1x384xf32, #tpu.memory_space<vmem>>, vector<1x128xf32>
      %cst_52 = arith.constant dense<0.000000e+00> : vector<64x128xf32>
      %80 = tpu.matmul %75, %76, %cst_52 {dimension_numbers = #tpu.dot_dimension_numbers<[1], [0], [0], [1], [0, 0, 1, 1], [], []>} : vector<64x128xbf16>, vector<128x128xbf16>, vector<64x128xf32> -> vector<64x128xf32>
      %81 = vector.broadcast %78 : vector<1x128xf32> to vector<64x128xf32>
      %82 = arith.addf %80, %81 : vector<64x128xf32>
      %83 = arith.truncf %82 : vector<64x128xf32> to vector<64x128xbf16>
      %c0_53 = arith.constant 0 : index
      %c0_54 = arith.constant 0 : index
      %84 = vector.load %arg11[%c0_53, %c0_54] : memref<64x128xbf16, #tpu.memory_space<vmem>>, vector<64x128xbf16>
      tpu.vector_store %arg11[%c0_53, %c0_54], %83 {strides = array<i32>} : memref<64x128xbf16, #tpu.memory_space<vmem>>, vector<64x128xbf16>,
      %cst_55 = arith.constant dense<0.000000e+00> : vector<64x128xf32>
      %85 = tpu.matmul %75, %77, %cst_55 {dimension_numbers = #tpu.dot_dimension_numbers<[1], [0], [0], [1], [0, 0, 1, 1], [], []>} : vector<64x128xbf16>, vector<128x128xbf16>, vector<64x128xf32> -> vector<64x128xf32>
      %86 = vector.broadcast %79 : vector<1x128xf32> to vector<64x128xf32>
      %87 = arith.addf %85, %86 : vector<64x128xf32>
      %88 = arith.truncf %87 : vector<64x128xf32> to vector<64x128xbf16>
      %c0_56 = arith.constant 0 : index
      %c0_57 = arith.constant 0 : index
      %89 = vector.load %arg12[%c0_56, %c0_57] : memref<64x128xbf16, #tpu.memory_space<vmem>>, vector<64x128xbf16>
      tpu.vector_store %arg12[%c0_56, %c0_57], %88 {strides = array<i32>} : memref<64x128xbf16, #tpu.memory_space<vmem>>, vector<64x128xbf16>,
    } else {
    }
    %c0 = arith.constant 0 : index
    %c0_1 = arith.constant 0 : index
    %3 = vector.load %arg10[%c0, %c0_1] : memref<2x128xf32, #tpu.memory_space<vmem>>, vector<1x128xf32>
    %c1 = arith.constant 1 : index
    %c0_2 = arith.constant 0 : index
    %4 = vector.load %arg10[%c1, %c0_2] : memref<2x128xf32, #tpu.memory_space<vmem>>, vector<1x128xf32>
    %c64_i32 = arith.constant 64 : i32
    %5 = arith.muli %arg1, %c64_i32 : i32
    %6 = tpu.assume_multiple %5, 64 : i32
    %c0_3 = arith.constant 0 : index
    %7 = arith.index_cast %6 : i32 to index
    %c0_4 = arith.constant 0 : index
    %8 = vector.load %arg2[%c0_3, %7, %c0_4] : memref<1x64x128xf32, #tpu.memory_space<vmem>>, vector<1x64x128xf32>
    %9 = vector.shape_cast %8 : vector<1x64x128xf32> to vector<64x128xf32>
    %10 = vector.broadcast %3 : vector<1x128xf32> to vector<64x128xf32>
    %11 = arith.mulf %9, %10 : vector<64x128xf32>
    %12 = vector.broadcast %4 : vector<1x128xf32> to vector<64x128xf32>
    %13 = arith.addf %11, %12 : vector<64x128xf32>
    %14 = arith.truncf %13 : vector<64x128xf32> to vector<64x128xbf16>
    %c0_5 = arith.constant 0 : index
    %c0_6 = arith.constant 0 : index
    %15 = vector.load %arg5[%c0_5, %c0_6] : memref<128x384xbf16, #tpu.memory_space<vmem>>, vector<128x128xbf16>
    %c0_7 = arith.constant 0 : index
    %c0_8 = arith.constant 0 : index
    %16 = vector.load %arg6[%c0_7, %c0_8] : memref<1x384xf32, #tpu.memory_space<vmem>>, vector<1x128xf32>
    %cst = arith.constant dense<0.000000e+00> : vector<64x128xf32>
    %17 = tpu.matmul %14, %15, %cst {dimension_numbers = #tpu.dot_dimension_numbers<[1], [0], [0], [1], [0, 0, 1, 1], [], []>} : vector<64x128xbf16>, vector<128x128xbf16>, vector<64x128xf32> -> vector<64x128xf32>
    %18 = vector.broadcast %16 : vector<1x128xf32> to vector<64x128xf32>
    %19 = arith.addf %17, %18 : vector<64x128xf32>
    %cst_9 = arith.constant 0.0883883461 : f32
    %20 = vector.broadcast %cst_9 : f32 to vector<64x128xf32>
    %21 = arith.mulf %19, %20 : vector<64x128xf32>
    %22 = arith.truncf %21 : vector<64x128xf32> to vector<64x128xbf16>
    %c0_10 = arith.constant 0 : index
    %c0_11 = arith.constant 0 : index
    %23 = vector.load %arg11[%c0_10, %c0_11] : memref<64x128xbf16, #tpu.memory_space<vmem>>, vector<64x128xbf16>
    %cst_12 = arith.constant dense<0.000000e+00> : vector<64x64xf32>
    %24 = tpu.matmul %22, %23, %cst_12 {dimension_numbers = #tpu.dot_dimension_numbers<[1], [1], [0], [0], [0, 0, 1, 0], [], []>} : vector<64x128xbf16>, vector<64x128xbf16>, vector<64x64xf32> -> vector<64x64xf32>
    %cst_13 = arith.constant dense<0xFF800000> : vector<64xf32>
    %25 = vector.multi_reduction <maximumf>, %24, %cst_13 [1] : vector<64x64xf32> to vector<64xf32>
    %26 = vector.shape_cast %25 : vector<64xf32> to vector<64x1xf32>
    %27 = vector.broadcast %26 : vector<64x1xf32> to vector<64x64xf32>
    %28 = arith.subf %24, %27 : vector<64x64xf32>
    %29 = math.exp %28 : vector<64x64xf32>
    %cst_14 = arith.constant dense<0.000000e+00> : vector<64xf32>
    %30 = vector.multi_reduction <add>, %29, %cst_14 [1] : vector<64x64xf32> to vector<64xf32>
    %31 = vector.shape_cast %30 : vector<64xf32> to vector<64x1xf32>
    %32 = arith.truncf %29 : vector<64x64xf32> to vector<64x64xbf16>
    %c0_15 = arith.constant 0 : index
    %c0_16 = arith.constant 0 : index
    %33 = vector.load %arg12[%c0_15, %c0_16] : memref<64x128xbf16, #tpu.memory_space<vmem>>, vector<64x128xbf16>
    %cst_17 = arith.constant dense<0.000000e+00> : vector<64x128xf32>
    %34 = tpu.matmul %32, %33, %cst_17 {dimension_numbers = #tpu.dot_dimension_numbers<[1], [0], [0], [1], [0, 0, 1, 1], [], []>} : vector<64x64xbf16>, vector<64x128xbf16>, vector<64x128xf32> -> vector<64x128xf32>
    %35 = tpu.reciprocal %31 {approx = true} : vector<64x1xf32> -> vector<64x1xf32>
    %36 = vector.broadcast %35 : vector<64x1xf32> to vector<64x128xf32>
    %37 = arith.mulf %34, %36 : vector<64x128xf32>
    %38 = arith.truncf %37 : vector<64x128xf32> to vector<64x128xbf16>
    %c0_18 = arith.constant 0 : index
    %c0_19 = arith.constant 0 : index
    %39 = vector.load %arg7[%c0_18, %c0_19] : memref<128x128xbf16, #tpu.memory_space<vmem>>, vector<128x128xbf16>
    %cst_20 = arith.constant dense<0.000000e+00> : vector<64x128xf32>
    %40 = tpu.matmul %38, %39, %cst_20 {dimension_numbers = #tpu.dot_dimension_numbers<[1], [0], [0], [1], [0, 0, 1, 1], [], []>} : vector<64x128xbf16>, vector<128x128xbf16>, vector<64x128xf32> -> vector<64x128xf32>
    %c0_21 = arith.constant 0 : index
    %c0_22 = arith.constant 0 : index
    %41 = vector.load %arg8[%c0_21, %c0_22] : memref<1x128xf32, #tpu.memory_space<vmem>>, vector<1x128xf32>
    %42 = vector.broadcast %41 : vector<1x128xf32> to vector<64x128xf32>
    %43 = arith.addf %40, %42 : vector<64x128xf32>
    %44 = arith.addf %9, %43 : vector<64x128xf32>
    %c0_23 = arith.constant 0 : index
    %c0_24 = arith.constant 0 : index
    %c0_25 = arith.constant 0 : index
    %45 = vector.load %arg9[%c0_23, %c0_24, %c0_25] : memref<1x64x128xf32, #tpu.memory_space<vmem>>, vector<1x64x128xf32>
    %46 = vector.shape_cast %45 : vector<1x64x128xf32> to vector<64x128xf32>
    %47 = vector.shape_cast %44 : vector<64x128xf32> to vector<1x64x128xf32>
    tpu.vector_store %arg9[%c0_23, %c0_24, %c0_25], %47 {strides = array<i32>} : memref<1x64x128xf32, #tpu.memory_space<vmem>>, vector<1x64x128xf32>,
    return
  }
  func.func @transform_0(%arg0: i32, %arg1: i32) -> (i32, i32, i32) {
    %c0_i32 = arith.constant 0 : i32
    %c0_i32_0 = arith.constant 0 : i32
    %c0_i32_1 = arith.constant 0 : i32
    return %arg0, %c0_i32, %c0_i32_0 : i32, i32, i32
  }
  func.func @transform_1(%arg0: i32, %arg1: i32) -> (i32, i32) {
    %c0_i32 = arith.constant 0 : i32
    %c0_i32_0 = arith.constant 0 : i32
    %c0_i32_1 = arith.constant 0 : i32
    return %c0_i32, %c0_i32_0 : i32, i32
  }
  func.func @transform_2(%arg0: i32, %arg1: i32) -> (i32, i32) {
    %c0_i32 = arith.constant 0 : i32
    %c0_i32_0 = arith.constant 0 : i32
    %c0_i32_1 = arith.constant 0 : i32
    return %c0_i32, %c0_i32_0 : i32, i32
  }
  func.func @transform_3(%arg0: i32, %arg1: i32) -> (i32, i32) {
    %c0_i32 = arith.constant 0 : i32
    %c0_i32_0 = arith.constant 0 : i32
    %c0_i32_1 = arith.constant 0 : i32
    return %c0_i32, %c0_i32_0 : i32, i32
  }
  func.func @transform_4(%arg0: i32, %arg1: i32) -> (i32, i32) {
    %c0_i32 = arith.constant 0 : i32
    %c0_i32_0 = arith.constant 0 : i32
    %c0_i32_1 = arith.constant 0 : i32
    return %c0_i32, %c0_i32_0 : i32, i32
  }
  func.func @transform_5(%arg0: i32, %arg1: i32) -> (i32, i32) {
    %c0_i32 = arith.constant 0 : i32
    %c0_i32_0 = arith.constant 0 : i32
    %c0_i32_1 = arith.constant 0 : i32
    return %c0_i32, %c0_i32_0 : i32, i32
  }
  func.func @transform_6(%arg0: i32, %arg1: i32) -> (i32, i32) {
    %c0_i32 = arith.constant 0 : i32
    %c0_i32_0 = arith.constant 0 : i32
    %c0_i32_1 = arith.constant 0 : i32
    return %c0_i32, %c0_i32_0 : i32, i32
  }
  func.func @transform_7(%arg0: i32, %arg1: i32) -> (i32, i32, i32) {
    %c0_i32 = arith.constant 0 : i32
    %c0_i32_0 = arith.constant 0 : i32
    return %arg0, %arg1, %c0_i32 : i32, i32, i32
  }
}

</mosaic_0001>

<bundles_post_ra>
// kernel: tpu_custom_call.1
= control target key start
LH: loop header
LB: loop body
LE: loop exit
PB: predicated region body
PF: predicated region fallthrough
CT: control target
= control target key end

     0   :  { %s2889_s0 = inlined_call_operand.hbm [shape: f32[2,64,128], index: 0, kind: input, shape index: {}]   ;;  %s2890_s1 = inlined_call_operand.vmem [shape: f32[2,128], index: 1, kind: input, shape index: {}]   ;;  %s2891_s2 = inlined_call_operand.hbm [shape: f32[128,128], index: 2, kind: input, shape index: {}]   ;;  %s2892_s3 = inlined_call_operand.hbm [shape: bf16[128,384], index: 3, kind: input, shape index: {}]   ;;  %s2893_s4 = inlined_call_operand.vmem [shape: f32[1,384], index: 4, kind: input, shape index: {}]   ;;  %s2894_s5 = inlined_call_operand.hbm [shape: bf16[128,128], index: 5, kind: input, shape index: {}]   ;;  %s2895_s6 = inlined_call_operand.vmem [shape: f32[1,128], index: 6, kind: input, shape index: {}]   ;;  %s2896_s7 = inlined_call_operand.hbm [shape: f32[2,64,128], index: 7, kind: output, shape index: {}]  }
   0x1   :  { %2906 = sst [smem:[#allocation20_spill]] %s2891_s2 }
   0x2   :  { %2907 = sst [smem:[#allocation21_spill]] %s2896_s7 }
   0x3   :  { %12 = vsyncpa [#allocation6], 0 }
   0x4   :  { %14 = vsyncpa [#allocation6 + $0x1], 0 }
   0x5   :  { %15 = vsyncpa [#allocation9], 0 }
   0x6   :  { %16 = vsyncpa [#allocation12], 0 }
   0x7   :  { %17 = vsyncpa [#allocation7], 0 }
   0x8   :  { %19 = vsyncpa [#allocation7 + $0x1], 0  ;;  %s2462_s24 = smov 0   ;;  %s2464_s25 = smov 0  }
   0x9   :  { %s2466_s26 = smov 0   ;;  %s2468_s27 = smov 0  }
   0xa   :  { %s2470_s28 = smov 0   ;;  %s2472_s29 = smov 0  }
   0xb LB: > { %2908 = sst [smem:[#allocation18_spill]] %s2384_s24  ;;  %s1613_s30 = sadd.s32 4294967295, %s2404_s29   ;;  %s2404_s29 = sphi %s2472_s29, %s25_s29   ;;  %s2400_s28 = sphi %s2470_s28, %s2935_s28   ;;  %s2396_s27 = sphi %s2468_s27, %s2934_s27   ;;  %s2392_s26 = sphi %s2466_s26, %s2933_s26   ;;  %s2388_s25 = sphi %s2464_s25, %s2932_s25   ;;  %s2384_s24 = sphi %s2462_s24, %s2931_s24  }
   0xc   : > { %s1614_s8 = sadd.s32 4294967294, %s2404_s29   ;;  %p57_p0 = scmp.ne.s32.totalorder %s2388_s25, %s2384_s24 }
   0xd   : > { %p2496_p1 = scmp.eq.s32.totalorder %s1613_s30, 0  ;;  %p2500_p2 = scmp.eq.s32.totalorder %s1613_s30, 1 }
   0xe   : > { %p215_p3 = scmp.eq.s32.totalorder %s1614_s8, 1  ;;  %p1615_p5 = scmp.ge.s32.totalorder %s2404_s29, 1 }
   0xf   : > { %s2909_s9 = scalar_select %p2496_p1, 1, 0 }
  0x10   : > { %s2910_s10 = scalar_select %p2500_p2, 1, 0 }
  0x11   : > { %p2506_p4 = por %p2496_p1, %p57_p0  ;;  %p2511_p6 = por %p215_p3, %p57_p0 }
  0x12   : > { %p222_p7 = scmp.lt.s32.totalorder %s2404_s29, 3  ;;  %s2406_s14 = smov [#allocation8]  }
  0x13   : > { %s2911_s11 = scalar_select %p2506_p4, 1, 0 }
  0x14   : > { %s2912_s12 = scalar_select %p2511_p6, 1, 0 }
  0x15   : > { %p2516_p8 = pnand %p1615_p5, %p222_p7  ;;  %s237_s15 = sshll.u32 %s2406_s14, 4  ;;  %s2520_s15 = int_to_ptr.vmem [resolvable:$true] %s237_s15 }
  0x16   : > { %2913 = sst [smem:[#allocation19_spill]] %s2912_s12  ;;  %s2407_s17 = smov [#allocation10]  }
  0x17   : > { %s2914_s13 = scalar_select %p2516_p8, 1, 0 }
  0x18   : > { %p2038_p9 = pneg %p2516_p8  ;;  %s250_s18 = sshll.u32 %s2407_s17, 4  ;;  %s2531_s18 = int_to_ptr.vmem [resolvable:$true] %s250_s18 }
  0x19   : > { %s2916_s2 = sld [smem:[#allocation20_spill]] }
  0x1a   : > { %p2527_p11 = pnand %p2038_p9, %p2496_p1 }
  0x1c   : > { %p2541_p13 = pneg %p2527_p11 }
  0x1f   : > { %s2200_s21 = scalar_lea.hbm %s2916_s2, 2048 }
  0x20   : > { %p2201_p12 = scmp.ne.s32.totalorder %s2916_s2, %s2200_s21  ;;  %p2207_p5 = scmp.lt.u32.totalorder %s2200_s21, %s2916_s2 }
  0x22   : > { %p2203_p0 = pnand %p2541_p13, %p2201_p12 }
  0x24   : > { %p2204_p3 = pneg %p2203_p0 }
  0x26   : > { %p2209_p7 = pnand %p2207_p5, %p2204_p3 }
  0x28   : > { %2212 = shalt.err (!%p2209_p7)
}
  0x29   : > { %s2213_s17 = scalar_lea.vmem %s2520_s15, 2048  ;;  %p2221_p1 = scmp.lt.s32.totalorder %s2520_s15, %s2520_s15 }
  0x2a   : > { %p2214_p9 = scmp.ne.s32.totalorder %s2520_s15, %s2213_s17  ;;  %p2222_p4 = scmp.lt.s32.totalorder %s2213_s17, %s2213_s17 }
  0x2c   : > { %p2216_p10 = pnand %p2214_p9, %p2541_p13  ;;  %p2223_p12 = por %p2222_p4, %p2221_p1 }
  0x2e   : > { %p2217_p6 = pneg %p2216_p10 }
  0x30   : > { %p2224_p0 = pnand %p2223_p12, %p2217_p6 }
  0x32   : > { %2227 = shalt.err (!%p2224_p0)
}
  0x33   : > { %s2903_s19 = smov 128   ;;  %s2904_s20 = smov 8  }
  0x34   : > { %2041 = dma.hbm_to_vmem [thread:$0]  (!%p2527_p11), %s2916_s2, 2048, %s2520_s15, [#allocation9], %s2903_s19, %s2903_s19, %s2904_s20  }
  0x35   : > { %s2228_s14 = scalar_lea.hbm %s2892_s3, 3072 }
  0x36   : > { %p2229_p1 = scmp.ne.s32.totalorder %s2892_s3, %s2228_s14  ;;  %p2235_p10 = scmp.lt.u32.totalorder %s2228_s14, %s2892_s3 }
  0x38   : > { %p2231_p4 = pnand %p2229_p1, %p2541_p13 }
  0x3a   : > { %p2232_p6 = pneg %p2231_p4 }
  0x3c   : > { %p2237_p3 = pnand %p2235_p10, %p2232_p6 }
  0x3e   : > { %2240 = shalt.err (!%p2237_p3)
}
  0x3f   : > { %s2241_s15 = scalar_lea.vmem %s2531_s18, 3072  ;;  %p2249_p12 = scmp.lt.s32.totalorder %s2531_s18, %s2531_s18 }
  0x40   : > { %p2242_p5 = scmp.ne.s32.totalorder %s2531_s18, %s2241_s15  ;;  %p2250_p0 = scmp.lt.s32.totalorder %s2241_s15, %s2241_s15 }
  0x42   : > { %p2244_p7 = pnand %p2242_p5, %p2541_p13  ;;  %p2251_p1 = por %p2250_p0, %p2249_p12 }
  0x44   : > { %p2245_p9 = pneg %p2244_p7 }
  0x46   : > { %p2252_p4 = pnand %p2251_p1, %p2245_p9 }
  0x48   : > { %2255 = shalt.err (!%p2252_p4)
}
  0x49   : > { %s2410_s12 = smov 192   ;;  %s2411_s7 = smov 12  }
  0x4a   : > { %2044 = dma.hbm_to_vmem [thread:$0]  (!%p2527_p11), %s2892_s3, 3072, %s2531_s18, [#allocation9], %s2410_s12, %s2410_s12, %s2411_s7  }
  0x4b   : > { %s2412_s22 = smov [#allocation11]   ;;  %s2256_s17 = scalar_lea.hbm %s2894_s5, 1024 }
  0x4c   : > { %s266_s23 = sshll.u32 %s2412_s22, 4  ;;  %p2257_p6 = scmp.ne.s32.totalorder %s2894_s5, %s2256_s17  ;;  %s267_s23 = int_to_ptr.vmem [resolvable:$true] %s266_s23 }
  0x4d   : > { %p2263_p5 = scmp.lt.u32.totalorder %s2256_s17, %s2894_s5 }
  0x4e   : > { %p2259_p10 = pnand %p2257_p6, %p2541_p13 }
  0x50   : > { %p2260_p3 = pneg %p2259_p10 }
  0x52   : > { %p2265_p7 = pnand %p2263_p5, %p2260_p3 }
  0x54   : > { %2268 = shalt.err (!%p2265_p7)
}
  0x55   : > { %s2269_s18 = scalar_lea.vmem %s267_s23, 1024  ;;  %p2277_p1 = scmp.lt.s32.totalorder %s267_s23, %s267_s23 }
  0x56   : > { %p2270_p9 = scmp.ne.s32.totalorder %s267_s23, %s2269_s18  ;;  %p2278_p4 = scmp.lt.s32.totalorder %s2269_s18, %s2269_s18 }
  0x58   : > { %p2272_p12 = pnand %p2270_p9, %p2541_p13  ;;  %p2279_p8 = por %p2278_p4, %p2277_p1 }
  0x5a   : > { %p2273_p0 = pneg %p2272_p12 }
  0x5c   : > { %p2280_p2 = pnand %p2279_p8, %p2273_p0 }
  0x5e   : > { %2283 = shalt.err (!%p2280_p2)
}
  0x5f   : > { %s2413_s19 = smov 64   ;;  %s2414_s2 = smov 4  }
  0x60   : > { %2047 = dma.hbm_to_vmem [thread:$0]  (!%p2527_p11), %s2894_s5, 1024, %s267_s23, [#allocation12], %s2413_s19, %s2413_s19, %s2414_s2  }
  0x61   : > { %s44_s12 = sadd.s32 1, %s2392_s26  ;;  %s37_s7 = sadd.s32 1, %s2400_s28 }
  0x62   : > { %p51_p2 = scmp.ne.s32.totalorder %s2392_s26, %s2388_s25  ;;  %p39_p8 = scmp.ge.s32.totalorder %s37_s7, 2 }
  0x63   : > { %p52_p13 = scmp.eq.s32.totalorder %s2404_s29, 0  ;;  %p2918_p6 = scmp.ne.s32.totalorder %s2910_s10, 0 }
  0x64   : > { %p2059_p3 = scmp.lt.s32.totalorder %s2404_s29, 2  ;;  %s2937_s7 = smov (%p39_p8, %s37_s7), 0 }
  0x65   : > { %p2613_p10 = por %p2918_p6, %p51_p2  ;;  %p53_p5 = por %p52_p13, %p51_p2 }
  0x66   : > { %s283_s16 = sand.u32 1, %s2392_s26   ;;  %s41_s21 = ssub.s32 %s2400_s28, %s2937_s7 }
  0x67   : > { %p42_p7 = scmp.eq.s32.totalorder %s41_s21, 0  ;;  %s1620_s22 = sshll.u32 %s283_s16, 6 }
  0x68   : > { %s1676_s23 = sshll.u32 %s2400_s28, 10  ;;  %s287_s15 = scalar_lea.vmem [#allocation5], %s1620_s22 }
  0x69   : > { %s2625_s8 = scalar_select %p42_p7, %s2392_s26, %s44_s12  }
  0x6a   : > { %s2630_s10 = scalar_lea.hbm %s2889_s0, %s1676_s23  ;;  %s294_s18 = sshll.u32 %s287_s15, 4  ;;  %s2632_s18 = int_to_ptr.vmem [resolvable:$true] %s294_s18 }
  0x6b   : > { %p2636_p11 = pnand %p2059_p3, %p53_p5  ;;  %s2640_s2 = scalar_lea.sflag [#allocation6], %s283_s16 }
  0x6c   : > { %s2284_s30 = scalar_lea.hbm %s2630_s10, 1024  ;;  %s2289_s21 = scalar_lea.hbm %s2889_s0, 2048 }
  0x6d   : > { %p2285_p9 = scmp.ne.s32.totalorder %s2630_s10, %s2284_s30  ;;  %p2286_p12 = pneg %p2636_p11 }
  0x6e   : > { %p2290_p4 = scmp.lt.u32.totalorder %s2630_s10, %s2889_s0  ;;  %p2291_p2 = scmp.lt.u32.totalorder %s2289_s21, %s2284_s30 }
  0x6f   : > { %p2287_p0 = pnand %p2286_p12, %p2285_p9  ;;  %p2293_p13 = scmp.lt.u32.totalorder %s2284_s30, %s2630_s10 }
  0x70   : > { %p2292_p8 = por %p2291_p2, %p2290_p4 }
  0x71   : > { %p2288_p1 = pneg %p2287_p0 }
  0x72   : > { %p2294_p6 = por %p2293_p13, %p2292_p8 }
  0x74   : > { %p2295_p3 = pnand %p2294_p6, %p2288_p1 }
  0x76   : > { %2298 = shalt.err (!%p2295_p3)
}
  0x77   : > { %s2299_s16 = scalar_lea.vmem %s2632_s18, 1024  ;;  %s2415_s14 = smov [#allocation5]  }
  0x78   : > { %p2300_p5 = scmp.ne.s32.totalorder %s2632_s18, %s2299_s16  ;;  %s2304_s17 = sshll.u32 %s2415_s14, 4  ;;  %s2305_s17 = int_to_ptr.vmem [resolvable:$false] %s2304_s17 }
  0x79   : > { %s2306_s15 = scalar_lea.vmem %s2305_s17, 2048  ;;  %p2307_p0 = scmp.lt.s32.totalorder %s2632_s18, %s2305_s17 }
  0x7a   : > { %p2302_p7 = pnand %p2300_p5, %p2286_p12  ;;  %p2308_p4 = scmp.lt.s32.totalorder %s2306_s15, %s2299_s16 }
  0x7c   : > { %p2303_p9 = pneg %p2302_p7  ;;  %p2309_p2 = por %p2308_p4, %p2307_p0 }
  0x7e   : > { %p2310_p8 = pnand %p2309_p2, %p2303_p9 }
  0x80   : > { %2313 = shalt.err (!%p2310_p8)
}
  0x81   : > { %s2921_s30 = smov 8   ;;  %s2922_s20 = smov 128  }
  0x82   : > { %2051 = dma.hbm_to_vmem [thread:$0]  (!%p2636_p11), %s2630_s10, 1024, %s2632_s18, %s2640_s2, %s2922_s20, %s2922_s20, %s2921_s30  }
  0x83   : > { %p2923_p12 = scmp.ne.s32.totalorder %s2914_s13, 0 }
  0x84   : > { %s2674_s12 = sand.u32 (!%p2923_p12), 1, %s2388_s25   ;;  %p2924_p1 = scmp.ne.s32.totalorder (!%p2923_p12), %s2911_s11, 0 }
  0x85   : > { %306 = sbr.rel (%p2923_p12) target bundleno = 1758 (0x6de), region = 48  ;;  %s1624_s21 = sshll.u32 (!%p2923_p12), %s2674_s12, 6 }
  0x86   : > { %s309_s22 = scalar_lea.sflag (!%p2923_p12), [#allocation6], %s2674_s12  ;;  %s2680_s19 = scalar_lea.vmem (!%p2923_p12), [#allocation5], %s1624_s21 }
  0x8c   : > { %2367 = dma.done.wait (%p2924_p1), %s309_s22, 1024  }
  0x8d   : > { %2369 = vsyncadd (%p2924_p1), %s309_s22, 4294966272  ;;  %p2925_p11 = scmp.ne.s32.totalorder %s2909_s9, 0 }
  0x8f   : > { %2371 = dma.done.wait (%p2925_p11), [#allocation9], 5120  }
  0x90   : > { %2373 = vsyncadd (%p2925_p11), [#allocation9], 4294962176 }
  0x91   : > { %2375 = dma.done.wait (%p2925_p11), [#allocation12], 1024  }
  0x92   : > { %2377 = vsyncadd (%p2925_p11), [#allocation12], 4294966272  ;;  %v2416_v0 = vmov 0.0|0.0   ;;  %vm2417_vm0 = vmmov 0   ;;  %v2418_v1 = vmov 0.0   ;;  %v382_v2 = vld [vmem:[#allocation8] sm:$0xff]  ;;  %v468_v50 = vlaneseq }
  0x93   : > { %1974 = vmatprep.subr.bf16.mxu0 %v2416_v0  ;;  %1808 = vmatprep.mubr.msk.f32.mxu0 %vm2417_vm0, %v2418_v1  ;;  %v383_v3 = vld [vmem:[#allocation8 + $0x8] sm:$0xff]  ;;  %v384_v4 = vld [vmem:[#allocation8 + $0x10] sm:$0xff]  ;;  %v385_v6 = vld [vmem:[#allocation8 + $0x18] sm:$0xff]  ;;  %vm1152_vm1 = vcmask 523264   ;;  %s2817_s20 = scalar_lea.vmem [#allocation13], %s1624_s21  ;;  %s1677_s22 = sshll.u32 %s2396_s27, 10 }
  0x94   : > { %1998 = vmatprep.subr.bf16.mxu1 %v2416_v0  ;;  %1843 = vmatprep.mubr.msk.f32.mxu1 %vm2417_vm0, %v2418_v1  ;;  %v1975_v5 = vpack.c.bf16 %v383_v3, %v382_v2  ;;  %v1978_v7 = vpack.c.bf16 %v385_v6, %v384_v4  ;;  %v386_v8 = vld [vmem:[#allocation8 + $0x20] sm:$0xff]  ;;  %v387_v9 = vld [vmem:[#allocation8 + $0x28] sm:$0xff]  ;;  %v388_v12 = vld [vmem:[#allocation8 + $0x30] sm:$0xff]  ;;  %v469_v51 = vshrl.u32 %v468_v50, 7  ;;  %s1498_s21 = sshll.u32 %s2817_s20, 4  ;;  %s2926_s11 = sld [smem:[#allocation21_spill]]  ;;  %s2828_s21 = int_to_ptr.vmem [resolvable:$true] %s1498_s21 }
  0x95   : > { %v2699_v10 = vld [vmem:[%s2680_s19] sm:$0xff]  ;;  %v2702_v11 = vld [vmem:[%s2680_s19 + $0x8] sm:$0xff]  ;;  %v2705_v13 = vld [vmem:[%s2680_s19 + $0x10] sm:$0xff]  ;;  %v1981_v15 = vpack.c.bf16 %v387_v9, %v386_v8  ;;  %s1483_s10 = scalar_lea.sflag [#allocation7], %s2674_s12  ;;  %s2314_s18 = scalar_lea.vmem %s2828_s21, 1024 }
  0x96   : > { %1976 = vmatpush3.bf16.msra.mxu0 %v1975_v5  ;;  %2000 = vmatpush3.bf16.msra.mxu1 %v1975_v5  ;;  %v369_v14 = vadd.f32 %v2702_v11, %v2699_v10  ;;  %v389_v16 = vld [vmem:[#allocation8 + $0x38] sm:$0xff]  ;;  %v2713_v18 = vld [vmem:[%s2680_s19 + $0x20] sm:$0xff]  ;;  %v2719_v20 = vld [vmem:[%s2680_s19 + $0x28] sm:$0xff]  ;;  %v2742_v52 = vsub.s32 0, %v469_v51  ;;  %p2315_p13 = scmp.ne.s32.totalorder %s2828_s21, %s2314_s18  ;;  %s2419_s2 = smov [#allocation13]  }
  0x97   : > { %1977 = vmatprep.subr.bf16.mxu0 %v2416_v0  ;;  %2001 = vmatprep.subr.bf16.mxu1 %v2416_v0  ;;  %v2710_v17 = vld [vmem:[%s2680_s19 + $0x18] sm:$0xff]  ;;  %v390_v21 = vld [vmem:[#allocation8 + $0x40] sm:$0xff]  ;;  %v391_v22 = vld [vmem:[#allocation8 + $0x48] sm:$0xff]  ;;  %v1984_v24 = vpack.c.bf16 %v389_v16, %v388_v12  ;;  %s2318_s23 = sshll.u32 %s2419_s2, 4  ;;  %s2319_s23 = int_to_ptr.vmem [resolvable:$false] %s2318_s23 }
  0x98   : > { %v370_v19 = vadd.f32 %v369_v14, %v2705_v13  ;;  %v2723_v25 = vld [vmem:[%s2680_s19 + $0x30] sm:$0xff]  ;;  %v2729_v27 = vld [vmem:[%s2680_s19 + $0x38] sm:$0xff]  ;;  %v1987_v31 = vpack.c.bf16 %v391_v22, %v390_v21  ;;  %v394_v33 = vld [vmem:[#allocation8 + $0x60] sm:$0xff]  ;;  %p2316_p6 = pnand %p2315_p13, %p2613_p10  ;;  %s2320_s16 = scalar_lea.vmem %s2319_s23, 2048 }
  0x99   : > { %v392_v28 = vld [vmem:[#allocation8 + $0x50] sm:$0xff]  ;;  %v393_v29 = vld [vmem:[#allocation8 + $0x58] sm:$0xff]  ;;  %v395_v36 = vld [vmem:[#allocation8 + $0x68] sm:$0xff]  ;;  %p2321_p5 = scmp.lt.s32.totalorder %s2828_s21, %s2319_s23  ;;  %p2322_p7 = scmp.lt.s32.totalorder %s2320_s16, %s2314_s18 }
  0x9a   : > { %1979 = vmatpush3.bf16.msra.mxu0 %v1978_v7  ;;  %2003 = vmatpush3.bf16.msra.mxu1 %v1978_v7  ;;  %v371_v23 = vadd.f32 %v370_v19, %v2710_v17  ;;  %v1990_v35 = vpack.c.bf16 %v393_v29, %v392_v28  ;;  %v396_v38 = vld [vmem:[#allocation8 + $0x70] sm:$0xff]  ;;  %v1993_v40 = vpack.c.bf16 %v395_v36, %v394_v33  ;;  %v397_v41 = vld [vmem:[#allocation8 + $0x78] sm:$0xff]  ;;  %v2129_v29 = vld [vmem:[#allocation10 + $0x20] ss:$12 sps:$4 sm:$0xff]   ;;  %s2836_s13 = scalar_lea.hbm %s2926_s11, %s1677_s22  ;;  %p2317_p3 = pneg %p2316_p6 }
  0x9b   : > { %1980 = vmatprep.subr.bf16.mxu0 %v2416_v0  ;;  %2004 = vmatprep.subr.bf16.mxu1 %v2416_v0  ;;  %v1996_v44 = vpack.c.bf16 %v397_v41, %v396_v38  ;;  %v2126_v47 = vld [vmem:[#allocation10 + $0x4] ss:$12 sps:$4 sm:$0xff]   ;;  %v2127_v48 = vld [vmem:[#allocation10 + $0x8] ss:$12 sps:$4 sm:$0xff]   ;;  %p2323_p9 = por %p2322_p7, %p2321_p5 }
  0x9c   : > { %v372_v26 = vadd.f32 %v371_v23, %v2713_v18  ;;  %v2128_v49 = vld [vmem:[#allocation10 + $0x1c] ss:$12 sps:$4 sm:$0xff]   ;;  %v2138_v38 = vld [vmem:[#allocation10 + $0x94] ss:$12 sps:$4 sm:$0xff]  }
  0x9d   : > { %v2133_v33 = vld [vmem:[#allocation10 + $0x50] ss:$12 sps:$4 sm:$0xff]   ;;  %p2324_p0 = pnand %p2323_p9, %p2317_p3 }
  0x9e   : > { %1982 = vmatpush3.bf16.msra.mxu0 %v1981_v15  ;;  %2006 = vmatpush3.bf16.msra.mxu1 %v1981_v15  ;;  %v373_v30 = vadd.f32 %v372_v26, %v2719_v20  ;;  %v2136_v36 = vld [vmem:[#allocation10 + $0x7c] ss:$12 sps:$4 sm:$0xff]  }
  0x9f   : > { %1983 = vmatprep.subr.bf16.mxu0 %v2416_v0  ;;  %2007 = vmatprep.subr.bf16.mxu1 %v2416_v0  ;;  %v2141_v41 = vld [vmem:[#allocation10 + $0xb0] ss:$12 sps:$4 sm:$0xff]  }
  0xa0   : > { %v374_v32 = vadd.f32 %v373_v30, %v2723_v25  ;;  %v2130_v30 = vld [vmem:[#allocation10 + $0x34] ss:$12 sps:$4 sm:$0xff]  }
  0xa2   : > { %1985 = vmatpush3.bf16.msra.mxu0 %v1984_v24  ;;  %2009 = vmatpush3.bf16.msra.mxu1 %v1984_v24  ;;  %v375_v34 = vadd.f32 %v374_v32, %v2729_v27  ;;  %v2132_v32 = vld [vmem:[#allocation10 + $0x4c] ss:$12 sps:$4 sm:$0xff]  }
  0xa3   : > { %1986 = vmatprep.subr.bf16.mxu0 %v2416_v0  ;;  %2010 = vmatprep.subr.bf16.mxu1 %v2416_v0 }
  0xa4   : > { %v376_v37 = vrot.slane %v375_v34, 4 }
  0xa6   : > { %1988 = vmatpush3.bf16.msra.mxu0 %v1987_v31  ;;  %2012 = vmatpush3.bf16.msra.mxu1 %v1987_v31  ;;  %v377_v39 = vadd.f32 %v376_v37, %v375_v34  ;;  %v2131_v31 = vld [vmem:[#allocation10 + $0x38] ss:$12 sps:$4 sm:$0xff]   ;;  %v2137_v37 = vld [vmem:[#allocation10 + $0x80] ss:$12 sps:$4 sm:$0xff]  }
  0xa7   : > { %1989 = vmatprep.subr.bf16.mxu0 %v2416_v0  ;;  %2013 = vmatprep.subr.bf16.mxu1 %v2416_v0  ;;  %v2134_v34 = vld [vmem:[#allocation10 + $0x64] ss:$12 sps:$4 sm:$0xff]  }
  0xa8   : > { %v378_v42 = vrot.slane %v377_v39, 2 }
  0xaa   : > { %1991 = vmatpush3.bf16.msra.mxu0 %v1990_v35  ;;  %2015 = vmatpush3.bf16.msra.mxu1 %v1990_v35  ;;  %v379_v43 = vadd.f32 %v378_v42, %v377_v39  ;;  %v2135_v35 = vld [vmem:[#allocation10 + $0x68] ss:$12 sps:$4 sm:$0xff]   ;;  %v2139_v39 = vld [vmem:[#allocation10 + $0x98] ss:$12 sps:$4 sm:$0xff]   ;;  %v2142_v42 = vld [vmem:[#allocation10] ss:$12 sps:$4 sm:$0xff]  }
  0xab   : > { %1992 = vmatprep.subr.bf16.mxu0 %v2416_v0  ;;  %2016 = vmatprep.subr.bf16.mxu1 %v2416_v0 }
  0xac   : > { %v380_v45 = vrot.slane %v379_v43, 1 }
  0xae   : > { %1994 = vmatpush3.bf16.msra.mxu0 %v1993_v40  ;;  %2018 = vmatpush3.bf16.msra.mxu1 %v1993_v40  ;;  %v381_v46 = vadd.f32 %v380_v45, %v379_v43  ;;  %v2140_v40 = vld [vmem:[#allocation10 + $0xac] ss:$12 sps:$4 sm:$0xff]  }
  0xaf   : > { %1995 = vmatprep.subr.bf16.mxu0 %v2416_v0  ;;  %2019 = vmatprep.subr.bf16.mxu1 %v2416_v0 }
  0xb2   : > { %1997 = vmatpush3.bf16.msra.mxu0 %v1996_v44  ;;  %2021 = vmatpush3.bf16.msra.mxu1 %v1996_v44 }
  0xb3   : > { %1846 = vmatprep.subr.bf16.mxu0 %v2126_v47  ;;  %1870 = vmatprep.subr.bf16.mxu1 %v2127_v48 }
  0xb5   : > { %1809 = vmatmul.mubr.f32.vlgmr.msra.gmra.mrb[0].mxu0 %v381_v46  ;;  %v572_v46 = vld [vmem:[%s2890_s1] sm:$0x1] }
  0xb6   : > { %1847 = vmatpush3.bf16.msra.mxu0 %v2126_v47 }
  0xb7   : > { %1848 = vmatprep.subr.bf16.mxu0 %v2128_v49 }
  0xba   : > { %1849 = vmatpush3.bf16.msra.mxu0 %v2128_v49  ;;  %v573_v49 = vld [vmem:[%s2890_s1 + $0x1] sm:$0x1] }
  0xbb   : > { %1850 = vmatprep.subr.bf16.mxu0 %v2130_v30 }
  0xbe   : > { %1851 = vmatpush3.bf16.msra.mxu0 %v2130_v30 }
  0xbf   : > { %1852 = vmatprep.subr.bf16.mxu0 %v2132_v32 }
  0xc2   : > { %1853 = vmatpush3.bf16.msra.mxu0 %v2132_v32 }
  0xc3   : > { %1854 = vmatprep.subr.bf16.mxu0 %v2134_v34 }
  0xc6   : > { %1855 = vmatpush3.bf16.msra.mxu0 %v2134_v34 }
  0xc7   : > { %1856 = vmatprep.subr.bf16.mxu0 %v2136_v36 }
  0xca   : > { %1857 = vmatpush3.bf16.msra.mxu0 %v2136_v36 }
  0xcb   : > { %1858 = vmatprep.subr.bf16.mxu0 %v2138_v38 }
  0xce   : > { %1859 = vmatpush3.bf16.msra.mxu0 %v2138_v38 }
  0xcf   : > { %1860 = vmatprep.subr.bf16.mxu0 %v2140_v40 }
  0xd2   : > { %1861 = vmatpush3.bf16.msra.mxu0 %v2140_v40 }
  0xd3   : > { %1894 = vmatprep.subr.bf16.mxu0 %v2142_v42 }
 0x188   : > { %v2744_v53 = vpop.f32.mrb[0].mxu0 }
 0x189   : > { %v471_v54 = vrot.slane %v2744_v53, %v2742_v52  ;;  %v1810_v55 = vpop.f32.mrb[1].mxu0 }
 0x18b   : > { %v472_v56 = vsub.f32 %v2699_v10, %v471_v54  ;;  %v473_v57 = vsub.f32 %v2702_v11, %v471_v54  ;;  %v474_v58 = vsub.f32 %v2705_v13, %v471_v54  ;;  %v475_v59 = vsub.f32 %v2710_v17, %v471_v54 }
 0x18c   : > { %v476_v62 = vsub.f32 %v2713_v18, %v471_v54  ;;  %v477_v1 = vsub.f32 %v2719_v20, %v471_v54  ;;  %v478_v4 = vsub.f32 %v2723_v25, %v471_v54  ;;  %v479_v7 = vsub.f32 %v2729_v27, %v471_v54 }
 0x18d   : > { %v480_v60 = vmul.f32 %v472_v56, %v472_v56  ;;  %v481_v61 = vmul.f32 %v473_v57, %v473_v57  ;;  %v482_v63 = vmul.f32 %v474_v58, %v474_v58  ;;  %v483_v2 = vmul.f32 %v475_v59, %v475_v59 }
 0x18e   : > { %v484_v5 = vmul.f32 %v476_v62, %v476_v62  ;;  %v485_v8 = vmul.f32 %v477_v1, %v477_v1  ;;  %v486_v12 = vmul.f32 %v478_v4, %v478_v4  ;;  %v487_v15 = vmul.f32 %v479_v7, %v479_v7 }
 0x18f   : > { %v488_v0 = vadd.f32 %v481_v61, %v480_v60 }
 0x191   : > { %v489_v3 = vadd.f32 %v488_v0, %v482_v63 }
 0x193   : > { %v490_v6 = vadd.f32 %v489_v3, %v483_v2 }
 0x195   : > { %v491_v9 = vadd.f32 %v490_v6, %v484_v5 }
 0x197   : > { %v492_v14 = vadd.f32 %v491_v9, %v485_v8  ;;  %v2143_v9 = vld [vmem:[#allocation10 + $0x18] ss:$12 sps:$4 sm:$0xff]  }
 0x199   : > { %v493_v16 = vadd.f32 %v492_v14, %v486_v12 }
 0x19b   : > { %v494_v19 = vadd.f32 %v493_v16, %v487_v15 }
 0x19d   : > { %v495_v21 = vrot.slane %v494_v19, 4 }
 0x19f   : > { %v496_v22 = vadd.f32 %v495_v21, %v494_v19  ;;  %v2144_v21 = vld [vmem:[#allocation10 + $0x30] ss:$12 sps:$4 sm:$0xff]  }
 0x1a1   : > { %v497_v23 = vrot.slane %v496_v22, 2 }
 0x1a3   : > { %v498_v24 = vadd.f32 %v497_v23, %v496_v22 }
 0x1a5   : > { %v499_v26 = vrot.slane %v498_v24, 1 }
 0x1a7   : > { %v500_v28 = vadd.f32 %v499_v26, %v498_v24  ;;  %v2145_v24 = vld [vmem:[#allocation10 + $0x48] ss:$12 sps:$4 sm:$0xff]  }
 0x1a9   : > { %1844 = vmatmul.mubr.f32.vlgmr.msra.gmra.mrb[0].mxu1 %v500_v28  ;;  %v2146_v28 = vld [vmem:[#allocation10 + $0x60] ss:$12 sps:$4 sm:$0xff]  }
 0x1aa   : > { %1871 = vmatpush3.bf16.msra.mxu1 %v2127_v48 }
 0x1ab   : > { %1872 = vmatprep.subr.bf16.mxu1 %v2129_v29 }
 0x1ae   : > { %1873 = vmatpush3.bf16.msra.mxu1 %v2129_v29  ;;  %v2149_v29 = vld [vmem:[#allocation10 + $0xa8] ss:$12 sps:$4 sm:$0xff]  }
 0x1af   : > { %1874 = vmatprep.subr.bf16.mxu1 %v2131_v31 }
 0x1b2   : > { %1875 = vmatpush3.bf16.msra.mxu1 %v2131_v31 }
 0x1b3   : > { %1876 = vmatprep.subr.bf16.mxu1 %v2133_v33 }
 0x1b6   : > { %1877 = vmatpush3.bf16.msra.mxu1 %v2133_v33 }
 0x1b7   : > { %1878 = vmatprep.subr.bf16.mxu1 %v2135_v35 }
 0x1ba   : > { %1879 = vmatpush3.bf16.msra.mxu1 %v2135_v35 }
 0x1bb   : > { %1880 = vmatprep.subr.bf16.mxu1 %v2137_v37 }
 0x1be   : > { %1881 = vmatpush3.bf16.msra.mxu1 %v2137_v37 }
 0x1bf   : > { %1882 = vmatprep.subr.bf16.mxu1 %v2139_v39 }
 0x1c2   : > { %1883 = vmatpush3.bf16.msra.mxu1 %v2139_v39 }
 0x1c3   : > { %1884 = vmatprep.subr.bf16.mxu1 %v2141_v41 }
 0x1c6   : > { %1885 = vmatpush3.bf16.msra.mxu1 %v2141_v41 }
 0x27c   : > { %v567_v43 = vpop.f32.mrb[0].mxu1 }
 0x27d   : > { %v568_v44 = vadd.f32 1e-05, %v567_v43  ;;  %v1845_v45 = vpop.f32.mrb[1].mxu1 }
 0x27f   : > { %2158 = vrsqrt.f32 %v568_v44  ;;  %v1638_v44 = vld [vmem:[%s2893_s4 + $0x2] ss:$0 sm:$0xff] }
 0x289   : > { %v2159_v47 = vpop.eup %2158 }
 0x28a   : > { %v574_v48 = vmul.f32 %v2159_v47, %v572_v46 }
 0x28c   : > { %v575_v50 = vmul.f32 %v574_v48, %v2744_v53  ;;  %577 = vst [vmem:[#allocation2] sm:$0x1] %v574_v48  ;;  %v582_v51 = vrot.slane %v574_v48, %v2742_v52 }
 0x28e   : > { %v576_v54 = vsub.f32 %v573_v49, %v575_v50  ;;  %v583_v55 = vmul.f32 %v582_v51, %v2699_v10  ;;  %v584_v57 = vmul.f32 %v582_v51, %v2702_v11  ;;  %v585_v58 = vmul.f32 %v582_v51, %v2705_v13 }
 0x28f   : > { %v586_v59 = vmul.f32 %v582_v51, %v2710_v17  ;;  %v587_v60 = vmul.f32 %v582_v51, %v2713_v18  ;;  %v588_v61 = vmul.f32 %v582_v51, %v2719_v20  ;;  %v589_v53 = vmul.f32 %v582_v51, %v2723_v25 }
 0x290   : > { %578 = vst [vmem:[#allocation2 + $0x1] sm:$0x1] %v576_v54  ;;  %v594_v56 = vrot.slane %v576_v54, %v2742_v52  ;;  %v590_v62 = vmul.f32 %v582_v51, %v2729_v27 }
 0x292   : > { %v595_v63 = vadd.f32 %v594_v56, %v583_v55  ;;  %v596_v0 = vadd.f32 %v594_v56, %v584_v57  ;;  %v597_v1 = vadd.f32 %v594_v56, %v585_v58  ;;  %v598_v2 = vadd.f32 %v594_v56, %v586_v59 }
 0x293   : > { %v599_v3 = vadd.f32 %v594_v56, %v587_v60  ;;  %v600_v52 = vadd.f32 %v594_v56, %v588_v61  ;;  %v601_v4 = vadd.f32 %v594_v56, %v589_v53  ;;  %v602_v5 = vadd.f32 %v594_v56, %v590_v62  ;;  %v1647_v14 = vld [vmem:[#allocation2] ss:$0 sm:$0xff] }
 0x294   : > { %v603_v6 = vpack.c.bf16 %v596_v0, %v595_v63  ;;  %v604_v7 = vpack.c.bf16 %v598_v2, %v597_v1  ;;  %v911_v16 = vmul.f32 %v1647_v14, %v2699_v10  ;;  %v912_v19 = vmul.f32 %v1647_v14, %v2702_v11  ;;  %v2147_v10 = vld [vmem:[#allocation10 + $0x78] ss:$12 sps:$4 sm:$0xff]   ;;  %v2148_v11 = vld [vmem:[#allocation10 + $0x90] ss:$12 sps:$4 sm:$0xff]  }
 0x295   : > { %v605_v8 = vpack.c.bf16 %v600_v52, %v599_v3  ;;  %v606_v12 = vpack.c.bf16 %v602_v5, %v601_v4  ;;  %v913_v30 = vmul.f32 %v1647_v14, %v2705_v13  ;;  %v914_v31 = vmul.f32 %v1647_v14, %v2710_v17 }
 0x296   : > { %1862 = vmatprep.mubr.bf16.mxu0 %v603_v6  ;;  %1886 = vmatprep.mubr.bf16.mxu1 %v603_v6  ;;  %v915_v32 = vmul.f32 %v1647_v14, %v2713_v18  ;;  %v916_v33 = vmul.f32 %v1647_v14, %v2719_v20  ;;  %v917_v40 = vmul.f32 %v1647_v14, %v2723_v25  ;;  %v1629_v20 = vld [vmem:[%s2893_s4 + $0x1] ss:$0 sm:$0xff] }
 0x297   : > { %1863 = vmatmul.mubr.bf16.vlgmr.msra.gmra.mrb[4].mxu0 %v604_v7  ;;  %1887 = vmatmul.mubr.bf16.vlgmr.msra.gmra.mrb[4].mxu1 %v604_v7  ;;  %v1648_v15 = vld [vmem:[#allocation2 + $0x1] ss:$0 sm:$0xff]  ;;  %v918_v13 = vmul.f32 %v1647_v14, %v2729_v27 }
 0x298   : > { %1895 = vmatpush3.bf16.msra.mxu0 %v2142_v42  ;;  %1866 = vmatprep.mubr.bf16.mxu0 %v605_v8  ;;  %v923_v22 = vadd.f32 %v1648_v15, %v911_v16  ;;  %v924_v23 = vadd.f32 %v1648_v15, %v912_v19  ;;  %v925_v34 = vadd.f32 %v1648_v15, %v913_v30 }
 0x299   : > { %1890 = vmatprep.mubr.bf16.mxu1 %v605_v8  ;;  %1896 = vmatprep.subr.bf16.mxu0 %v2143_v9  ;;  %v926_v35 = vadd.f32 %v1648_v15, %v914_v31  ;;  %v927_v36 = vadd.f32 %v1648_v15, %v915_v32  ;;  %v928_v37 = vadd.f32 %v1648_v15, %v916_v33 }
 0x29a   : > { %v931_v26 = vpack.c.bf16 %v924_v23, %v923_v22  ;;  %v929_v17 = vadd.f32 %v1648_v15, %v917_v40  ;;  %v930_v41 = vadd.f32 %v1648_v15, %v918_v13  ;;  %v1649_v23 = vld [vmem:[%s2893_s4] ss:$0 sm:$0xff] }
 0x29b   : > { %v932_v38 = vpack.c.bf16 %v926_v35, %v925_v34  ;;  %v933_v39 = vpack.c.bf16 %v928_v37, %v927_v36 }
 0x29c   : > { %1897 = vmatpush3.bf16.msra.mxu0 %v2143_v9  ;;  %v934_v42 = vpack.c.bf16 %v930_v41, %v929_v17 }
 0x29d   : > { %1898 = vmatprep.subr.bf16.mxu0 %v2144_v21 }
 0x29f   : > { %1867 = vmatmul.mubr.bf16.gmra.mrb[8].mxu0 %v606_v12  ;;  %1891 = vmatmul.mubr.bf16.gmra.mrb[8].mxu1 %v606_v12 }
 0x2a0   : > { %1899 = vmatpush3.bf16.msra.mxu0 %v2144_v21  ;;  %1910 = vmatprep.mubr.bf16.mxu0 %v931_v26 }
 0x2a1   : > { %1900 = vmatprep.subr.bf16.mxu0 %v2145_v24 }
 0x2a4   : > { %1901 = vmatpush3.bf16.msra.mxu0 %v2145_v24 }
 0x2a5   : > { %1902 = vmatprep.subr.bf16.mxu0 %v2146_v28 }
 0x2a8   : > { %1903 = vmatpush3.bf16.msra.mxu0 %v2146_v28 }
 0x2a9   : > { %1904 = vmatprep.subr.bf16.mxu0 %v2147_v10 }
 0x2ac   : > { %1905 = vmatpush3.bf16.msra.mxu0 %v2147_v10 }
 0x2ad   : > { %1906 = vmatprep.subr.bf16.mxu0 %v2148_v11 }
 0x2b0   : > { %1907 = vmatpush3.bf16.msra.mxu0 %v2148_v11 }
 0x2b1   : > { %1908 = vmatprep.subr.bf16.mxu0 %v2149_v29 }
 0x2b4   : > { %1909 = vmatpush3.bf16.msra.mxu0 %v2149_v29 }
 0x2b7   : > { %1911 = vmatmul.mubr.bf16.vlgmr.msra.gmra.mrb[12].mxu0 %v932_v38 }
 0x2b8   : > { %1914 = vmatprep.mubr.bf16.mxu0 %v933_v39 }
 0x2bf   : > { %1915 = vmatmul.mubr.bf16.gmra.mrb[16].mxu0 %v934_v42 }
 0x36a   : > { %v1864_v18 = vpop.f32.mrb[4].mxu0  ;;  %v1888_v43 = vpop.f32.mrb[4].mxu1 }
 0x36b   : > { %v729_v45 = vpop.f32.mrb[5].mxu0  ;;  %v856_v46 = vpop.f32.mrb[5].mxu1  ;;  %v738_v27 = vadd.f32 %v1864_v18, %v1629_v20  ;;  %v865_v48 = vadd.f32 %v1888_v43, %v1638_v44 }
 0x36c   : > { %v1865_v25 = vpop.f32.mrb[6].mxu0  ;;  %v1889_v47 = vpop.f32.mrb[6].mxu1  ;;  %v730_v55 = vadd.f32 %v1629_v20, %v729_v45  ;;  %v857_v56 = vadd.f32 %v1638_v44, %v856_v46 }
 0x36d   : > { %v741_v49 = vadd.f32 %v1865_v25, %v1629_v20  ;;  %v868_v50 = vadd.f32 %v1889_v47, %v1638_v44  ;;  %v732_v51 = vpop.f32.mrb[7].mxu0  ;;  %v859_v54 = vpop.f32.mrb[7].mxu1 }
 0x36e   : > { %v733_v57 = vadd.f32 %v1629_v20, %v732_v51  ;;  %v860_v58 = vadd.f32 %v1638_v44, %v859_v54 }
 0x36f   : > { %v761_v59 = vpack.c.bf16 %v741_v49, %v738_v27  ;;  %v888_v60 = vpack.c.bf16 %v868_v50, %v865_v48 }
 0x370   : > { %v760_v61 = vpack.c.bf16 %v733_v57, %v730_v55  ;;  %v887_v53 = vpack.c.bf16 %v860_v58, %v857_v56 }
 0x372   : > { %v1868_v62 = vpop.f32.mrb[8].mxu0  ;;  %v1892_v63 = vpop.f32.mrb[8].mxu1  ;;  %1918 = vmatprep.subr.bf16.mxu1 %v760_v61  ;;  %1934 = vmatprep.subr.bf16.mxu0 %v887_v53 }
 0x373   : > { %v745_v0 = vpop.f32.mrb[9].mxu0  ;;  %v872_v1 = vpop.f32.mrb[9].mxu1  ;;  %1919 = vmatpush3.bf16.xpose.msra.mxu1 %v760_v61  ;;  %1935 = vmatpush3.bf16.msra.mxu0 %v887_v53  ;;  %v754_v52 = vadd.f32 %v1868_v62, %v1629_v20  ;;  %v881_v4 = vadd.f32 %v1892_v63, %v1638_v44 }
 0x374   : > { %v1869_v2 = vpop.f32.mrb[10].mxu0  ;;  %v1893_v3 = vpop.f32.mrb[10].mxu1  ;;  %1920 = vmatprep.subr.bf16.mxu1 %v761_v59  ;;  %1936 = vmatprep.subr.bf16.mxu0 %v888_v60  ;;  %v746_v9 = vadd.f32 %v1629_v20, %v745_v0  ;;  %v873_v12 = vadd.f32 %v1638_v44, %v872_v1 }
 0x375   : > { %v757_v5 = vadd.f32 %v1869_v2, %v1629_v20  ;;  %v884_v6 = vadd.f32 %v1893_v3, %v1638_v44  ;;  %v748_v7 = vpop.f32.mrb[11].mxu0  ;;  %v875_v8 = vpop.f32.mrb[11].mxu1 }
 0x376   : > { %v749_v14 = vadd.f32 %v1629_v20, %v748_v7  ;;  %v876_v15 = vadd.f32 %v1638_v44, %v875_v8 }
 0x377   : > { %v763_v16 = vpack.c.bf16 %v757_v5, %v754_v52  ;;  %v890_v19 = vpack.c.bf16 %v884_v6, %v881_v4  ;;  %1937 = vmatpush3.bf16.msra.mxu0 %v888_v60 }
 0x378   : > { %v762_v21 = vpack.c.bf16 %v749_v14, %v746_v9  ;;  %v889_v22 = vpack.c.bf16 %v876_v15, %v873_v12 }
 0x37a   : > { %1938 = vmatprep.subr.bf16.mxu0 %v889_v22 }
 0x37b   : > { %1921 = vmatpush3.bf16.xpose.msra.mxu1 %v761_v59  ;;  %1939 = vmatpush3.bf16.msra.mxu0 %v889_v22 }
 0x37c   : > { %1922 = vmatprep.subr.bf16.mxu1 %v762_v21  ;;  %1940 = vmatprep.subr.bf16.mxu0 %v890_v19 }
 0x37f   : > { %1941 = vmatpush3.bf16.msra.mxu0 %v890_v19 }
 0x383   : > { %1923 = vmatpush3.bf16.xpose.msra.mxu1 %v762_v21 }
 0x384   : > { %1924 = vmatprep.subr.bf16.mxu1 %v763_v16 }
 0x38a   : > { %v1912_v24 = vpop.f32.mrb[12].mxu0 }
 0x38b   : > { %v1049_v26 = vadd.f32 %v1912_v24, %v1649_v23  ;;  %v1040_v28 = vpop.f32.mrb[13].mxu0  ;;  %1925 = vmatpush3.bf16.xpose.msra.mxu1 %v763_v16 }
 0x38c   : > { %v1041_v10 = vadd.f32 %v1649_v23, %v1040_v28  ;;  %v1913_v11 = vpop.f32.mrb[14].mxu0 }
 0x38d   : > { %v1052_v29 = vadd.f32 %v1913_v11, %v1649_v23  ;;  %v1043_v30 = vpop.f32.mrb[15].mxu0  ;;  %v1073_v32 = vmul.f32 0.088388346, %v1049_v26 }
 0x38e   : > { %v1044_v31 = vadd.f32 %v1649_v23, %v1043_v30  ;;  %v1071_v34 = vmul.f32 0.088388346, %v1041_v10 }
 0x38f   : > { %v1074_v33 = vmul.f32 0.088388346, %v1052_v29 }
 0x390   : > { %v1072_v35 = vmul.f32 0.088388346, %v1044_v31 }
 0x391   : > { %v1080_v36 = vpack.c.bf16 %v1074_v33, %v1073_v32 }
 0x392   : > { %v1079_v37 = vpack.c.bf16 %v1072_v35, %v1071_v34  ;;  %v1916_v38 = vpop.f32.mrb[16].mxu0 }
 0x393   : > { %v1065_v39 = vadd.f32 %v1916_v38, %v1649_v23  ;;  %v1056_v40 = vpop.f32.mrb[17].mxu0 }
 0x394   : > { %v1057_v13 = vadd.f32 %v1649_v23, %v1056_v40  ;;  %v1917_v17 = vpop.f32.mrb[18].mxu0  ;;  %1926 = vmatprep.mubr.bf16.mxu1 %v1079_v37 }
 0x395   : > { %v1068_v41 = vadd.f32 %v1917_v17, %v1649_v23  ;;  %v1059_v42 = vpop.f32.mrb[19].mxu0  ;;  %1927 = vmatmul.mubr.bf16.vlgmr.msra.gmra.mrb[12].mxu1 %v1080_v36  ;;  %v1077_v20 = vmul.f32 0.088388346, %v1065_v39 }
 0x396   : > { %v1060_v18 = vadd.f32 %v1649_v23, %v1059_v42  ;;  %v1075_v44 = vmul.f32 0.088388346, %v1057_v13 }
 0x397   : > { %v1078_v43 = vmul.f32 0.088388346, %v1068_v41 }
 0x398   : > { %v1076_v45 = vmul.f32 0.088388346, %v1060_v18 }
 0x399   : > { %v1082_v46 = vpack.c.bf16 %v1078_v43, %v1077_v20 }
 0x39a   : > { %v1081_v25 = vpack.c.bf16 %v1076_v45, %v1075_v44  ;;  %v2150_v44 = vld [vmem:[#allocation11] sm:$0xff]   ;;  %v2151_v45 = vld [vmem:[#allocation11 + $0x8] sm:$0xff]  }
 0x39b   : > { %1950 = vmatprep.subr.bf16.mxu1 %v2150_v44 }
 0x39c   : > { %1930 = vmatprep.mubr.bf16.mxu1 %v1081_v25  ;;  %1951 = vmatpush3.bf16.msra.mxu1 %v2150_v44  ;;  %v2153_v25 = vld [vmem:[#allocation11 + $0x18] sm:$0xff]  }
 0x39d   : > { %1931 = vmatmul.mubr.bf16.gmra.mrb[16].mxu1 %v1082_v46  ;;  %1952 = vmatprep.subr.bf16.mxu1 %v2151_v45  ;;  %v2152_v46 = vld [vmem:[#allocation11 + $0x10] sm:$0xff]  }
 0x3a0   : > { %1953 = vmatpush3.bf16.msra.mxu1 %v2151_v45 }
 0x3a1   : > { %1954 = vmatprep.subr.bf16.mxu1 %v2152_v46 }
 0x3a4   : > { %1955 = vmatpush3.bf16.msra.mxu1 %v2152_v46  ;;  %v2196_v46 = vld [vmem:[%s2680_s19 + $0x30] sm:$0xff] }
 0x3a5   : > { %1956 = vmatprep.subr.bf16.mxu1 %v2153_v25 }
 0x3a8   : > { %1957 = vmatpush3.bf16.msra.mxu1 %v2153_v25 }
 0x468   : > { %v1928_v47 = vpop.f32.mrb[12].mxu1 }
 0x469   : > { %v1121_v27 = vpop.f32.mrb[13].mxu1  ;;  %v1159_v48 = vsel %vm1152_vm1, %v1928_v47, -inf }
 0x46a   : > { %1160 = vmax.xlane.f32.xlu1 %v1159_v48  ;;  %v1929_v49 = vpop.f32.mrb[14].mxu1  ;;  %v1153_v50 = vsel %vm1152_vm1, %v1121_v27, -inf  ;;  %v2156_v48 = vld [vmem:[#allocation11 + $0x30] sm:$0xff]  }
 0x46b   : > { %1154 = vmax.xlane.f32.xlu0 %v1153_v50  ;;  %v1124_v51 = vpop.f32.mrb[15].mxu1  ;;  %v1162_v54 = vsel %vm1152_vm1, %v1929_v49, -inf }
 0x46c   : > { %v1156_v55 = vsel %vm1152_vm1, %v1124_v51, -inf }
 0x46e   : > { %1163 = vmax.xlane.f32.xlu1 %v1162_v54 }
 0x46f   : > { %1157 = vmax.xlane.f32.xlu0 %v1156_v55 }
 0x470   : > { %v1932_v56 = vpop.f32.mrb[16].mxu1 }
 0x471   : > { %v1137_v57 = vpop.f32.mrb[17].mxu1  ;;  %v1171_v53 = vsel %vm1152_vm1, %v1932_v56, -inf }
 0x472   : > { %v1933_v58 = vpop.f32.mrb[18].mxu1  ;;  %v1165_v59 = vsel %vm1152_vm1, %v1137_v57, -inf }
 0x473   : > { %1166 = vmax.xlane.f32.xlu0 %v1165_v59  ;;  %v1140_v60 = vpop.f32.mrb[19].mxu1  ;;  %v1174_v62 = vsel %vm1152_vm1, %v1933_v58, -inf }
 0x474   : > { %v1168_v61 = vsel %vm1152_vm1, %v1140_v60, -inf }
 0x475   : > { %1169 = vmax.xlane.f32.xlu1 %v1168_v61 }
 0x477   : > { %1172 = vmax.xlane.f32.xlu0 %v1171_v53 }
 0x479   : > { %1175 = vmax.xlane.f32.xlu1 %v1174_v62 }
 0x4f7   : > { %v1161_v63 = vpop.xlane.xlu1 %1160 }
 0x4f8   : > { %v1179_v0 = vsub.f32 %v1928_v47, %v1161_v63  ;;  %v1155_v1 = vpop.xlane.xlu0 %1154  ;;  %v2154_v47 = vld [vmem:[#allocation11 + $0x20] sm:$0xff]  }
 0x4f9   : > { %v1177_v2 = vsub.f32 %v1121_v27, %v1155_v1  ;;  %1958 = vmatprep.subr.bf16.mxu1 %v2154_v47  ;;  %v2155_v27 = vld [vmem:[#allocation11 + $0x28] sm:$0xff]  }
 0x4fa   : > { %v1189_v3 = vmul.f32 1.442695, %v1179_v0  ;;  %1959 = vmatpush3.bf16.msra.mxu1 %v2154_v47 }
 0x4fb   : > { %v1185_v52 = vmul.f32 1.442695, %v1177_v2  ;;  %v1164_v4 = vpop.xlane.xlu1 %1163  ;;  %1960 = vmatprep.subr.bf16.mxu1 %v2155_v27 }
 0x4fc   : > { %v1180_v5 = vsub.f32 %v1929_v49, %v1164_v4  ;;  %v1158_v6 = vpop.xlane.xlu0 %1157  ;;  %v2157_v49 = vld [vmem:[#allocation11 + $0x38] sm:$0xff]  }
 0x4fd   : > { %2160 = vpow2.f32 %v1185_v52  ;;  %v1178_v7 = vsub.f32 %v1124_v51, %v1158_v6 }
 0x4fe   : > { %v1191_v8 = vmul.f32 1.442695, %v1180_v5  ;;  %2162 = vpow2.f32 %v1189_v3  ;;  %1961 = vmatpush3.bf16.msra.mxu1 %v2155_v27 }
 0x4ff   : > { %v1187_v9 = vmul.f32 1.442695, %v1178_v7  ;;  %1962 = vmatprep.subr.bf16.mxu1 %v2156_v48 }
 0x500   : > { %2164 = vpow2.f32 %v1191_v8  ;;  %v1167_v12 = vpop.xlane.xlu0 %1166 }
 0x501   : > { %2166 = vpow2.f32 %v1187_v9  ;;  %v1181_v14 = vsub.f32 %v1137_v57, %v1167_v12 }
 0x502   : > { %v1170_v15 = vpop.xlane.xlu1 %1169  ;;  %1963 = vmatpush3.bf16.msra.mxu1 %v2156_v48  ;;  %v2197_v48 = vld [vmem:[%s2680_s19 + $0x20] sm:$0xff] }
 0x503   : > { %v1193_v16 = vmul.f32 1.442695, %v1181_v14  ;;  %v1182_v19 = vsub.f32 %v1140_v60, %v1170_v15  ;;  %1964 = vmatprep.subr.bf16.mxu1 %v2157_v49 }
 0x504   : > { %v1173_v21 = vpop.xlane.xlu0 %1172 }
 0x505   : > { %2168 = vpow2.f32 %v1193_v16  ;;  %v1195_v22 = vmul.f32 1.442695, %v1182_v19  ;;  %v1183_v23 = vsub.f32 %v1932_v56, %v1173_v21 }
 0x506   : > { %v1176_v24 = vpop.xlane.xlu1 %1175  ;;  %1965 = vmatpush3.bf16.msra.mxu1 %v2157_v49 }
 0x507   : > { %v2161_v26 = vpop.eup %2160  ;;  %2170 = vpow2.f32 %v1195_v22  ;;  %v1197_v28 = vmul.f32 1.442695, %v1183_v23  ;;  %v1184_v10 = vsub.f32 %v1933_v58, %v1176_v24 }
 0x508   : > { %v1201_v11 = vsel %vm1152_vm1, %v2161_v26, 0.0  ;;  %v2163_v29 = vpop.eup %2162 }
 0x509   : > { %2172 = vpow2.f32 %v1197_v28  ;;  %v1199_v30 = vmul.f32 1.442695, %v1184_v10  ;;  %1202 = vadd.xlane.f32.xlu0 %v1201_v11  ;;  %v1207_v34 = vsel %vm1152_vm1, %v2163_v29, 0.0  ;;  %v1662_v11 = vld [vmem:[%s2895_s6] ss:$0 sm:$0xff] }
 0x50a   : > { %v2165_v31 = vpop.eup %2164 }
 0x50b   : > { %v2167_v32 = vpop.eup %2166  ;;  %v1226_v33 = vpack.c.bf16 %v2165_v31, %v2163_v29  ;;  %2174 = vpow2.f32 %v1199_v30  ;;  %v1210_v39 = vsel %vm1152_vm1, %v2165_v31, 0.0 }
 0x50c   : > { %v1204_v35 = vsel %vm1152_vm1, %v2167_v32, 0.0  ;;  %v1225_v36 = vpack.c.bf16 %v2167_v32, %v2161_v26 }
 0x50d   : > { %1208 = vadd.xlane.f32.xlu0 %v1207_v34  ;;  %1205 = vadd.xlane.f32.xlu1 %v1204_v35  ;;  %v2192_v34 = vld [vmem:[%s2680_s19 + $0x10] sm:$0xff] }
 0x50e   : > { %1942 = vmatprep.mubr.msk.bf16.mxu0 %vm1152_vm1, %v1225_v36 }
 0x50f   : > { %v2169_v37 = vpop.eup %2168  ;;  %1943 = vmatmul.mubr.msk.bf16.vlgmr.msra.gmra.mrb[20].mxu0 %vm1152_vm1, %v1226_v33 }
 0x510   : > { %v1213_v38 = vsel %vm1152_vm1, %v2169_v37, 0.0 }
 0x511   : > { %v2171_v40 = vpop.eup %2170  ;;  %1214 = vadd.xlane.f32.xlu0 %v1213_v38  ;;  %1211 = vadd.xlane.f32.xlu1 %v1210_v39  ;;  %v2193_v38 = vld [vmem:[%s2680_s19] sm:$0xff] }
 0x512   : > { %v1227_v13 = vpack.c.bf16 %v2171_v40, %v2169_v37  ;;  %v1216_v42 = vsel %vm1152_vm1, %v2171_v40, 0.0 }
 0x513   : > { %v2173_v17 = vpop.eup %2172 }
 0x514   : > { %1946 = vmatprep.mubr.msk.bf16.mxu0 %vm1152_vm1, %v1227_v13  ;;  %v1219_v41 = vsel %vm1152_vm1, %v2173_v17, 0.0  ;;  %v2194_v13 = vld [vmem:[%s2680_s19 + $0x18] sm:$0xff] }
 0x515   : > { %v2175_v18 = vpop.eup %2174  ;;  %1220 = vadd.xlane.f32.xlu0 %v1219_v41  ;;  %1217 = vadd.xlane.f32.xlu1 %v1216_v42  ;;  %v2195_v41 = vld [vmem:[%s2680_s19 + $0x8] sm:$0xff] }
 0x516   : > { %v1228_v20 = vpack.c.bf16 %v2175_v18, %v2173_v17  ;;  %v1222_v43 = vsel %vm1152_vm1, %v2175_v18, 0.0 }
 0x518   : > { %1947 = vmatmul.mubr.msk.bf16.gmra.mrb[24].mxu0 %vm1152_vm1, %v1228_v20 }
 0x519   : > { %1223 = vadd.xlane.f32.xlu1 %v1222_v43 }
 0x596   : > { %v1203_v50 = vpop.xlane.xlu0 %1202 }
 0x597   : > { %2176 = vrcp.f32 %v1203_v50 }
 0x59a   : > { %v1206_v51 = vpop.xlane.xlu1 %1205  ;;  %v1209_v54 = vpop.xlane.xlu0 %1208 }
 0x59b   : > { %2178 = vrcp.f32 %v1209_v54 }
 0x59e   : > { %v1212_v55 = vpop.xlane.xlu1 %1211  ;;  %v1215_v56 = vpop.xlane.xlu0 %1214 }
 0x59f   : > { %2180 = vrcp.f32 %v1212_v55  ;;  %v2199_v55 = vld [vmem:[%s2680_s19 + $0x28] sm:$0xff] }
 0x5a0   : > { %2182 = vrcp.f32 %v1206_v51  ;;  %v2198_v51 = vld [vmem:[%s2680_s19 + $0x38] sm:$0xff] }
 0x5a1   : > { %2184 = vrcp.f32 %v1215_v56  ;;  %v2177_v60 = vpop.eup %2176 }
 0x5a2   : > { %v1218_v57 = vpop.xlane.xlu1 %1217  ;;  %v1221_v58 = vpop.xlane.xlu0 %1220 }
 0x5a3   : > { %2186 = vrcp.f32 %v1221_v58 }
 0x5a5   : > { %v2179_v53 = vpop.eup %2178 }
 0x5a6   : > { %v1224_v59 = vpop.xlane.xlu1 %1223 }
 0x5a7   : > { %2188 = vrcp.f32 %v1224_v59 }
 0x5a8   : > { %2190 = vrcp.f32 %v1218_v57 }
 0x5a9   : > { %v2181_v63 = vpop.eup %2180 }
 0x5aa   : > { %v2183_v1 = vpop.eup %2182 }
 0x5ab   : > { %v2185_v8 = vpop.eup %2184 }
 0x5ad   : > { %v2187_v12 = vpop.eup %2186 }
 0x5b1   : > { %v2189_v15 = vpop.eup %2188 }
 0x5b2   : > { %v2191_v19 = vpop.eup %2190 }
 0x5e2   : > { %v1944_v61 = vpop.f32.mrb[20].mxu0 }
 0x5e3   : > { %v1279_v62 = vpop.f32.mrb[21].mxu0  ;;  %v1320_v2 = vmul.f32 %v2179_v53, %v1944_v61 }
 0x5e4   : > { %v1945_v0 = vpop.f32.mrb[22].mxu0  ;;  %v1318_v4 = vmul.f32 %v2177_v60, %v1279_v62 }
 0x5e5   : > { %v1321_v3 = vmul.f32 %v2181_v63, %v1945_v0  ;;  %v1282_v52 = vpop.f32.mrb[23].mxu0 }
 0x5e6   : > { %v1319_v5 = vmul.f32 %v2183_v1, %v1282_v52 }
 0x5e7   : > { %v1327_v6 = vpack.c.bf16 %v1321_v3, %v1320_v2 }
 0x5e8   : > { %v1326_v7 = vpack.c.bf16 %v1319_v5, %v1318_v4 }
 0x5ea   : > { %1966 = vmatprep.mubr.bf16.mxu1 %v1326_v7 }
 0x5eb   : > { %v1948_v9 = vpop.f32.mrb[24].mxu0  ;;  %1967 = vmatmul.mubr.bf16.vlgmr.msra.gmra.mrb[20].mxu1 %v1327_v6 }
 0x5ec   : > { %v1295_v14 = vpop.f32.mrb[25].mxu0  ;;  %v1324_v21 = vmul.f32 %v2187_v12, %v1948_v9 }
 0x5ed   : > { %v1949_v16 = vpop.f32.mrb[26].mxu0  ;;  %v1322_v24 = vmul.f32 %v2185_v8, %v1295_v14 }
 0x5ee   : > { %v1325_v22 = vmul.f32 %v2189_v15, %v1949_v16  ;;  %v1298_v23 = vpop.f32.mrb[27].mxu0 }
 0x5ef   : > { %v1323_v26 = vmul.f32 %v2191_v19, %v1298_v23 }
 0x5f0   : > { %v1329_v28 = vpack.c.bf16 %v1325_v22, %v1324_v21 }
 0x5f1   : > { %v1328_v10 = vpack.c.bf16 %v1323_v26, %v1322_v24 }
 0x5f3   : > { %1970 = vmatprep.mubr.bf16.mxu1 %v1328_v10 }
 0x5f4   : > { %1971 = vmatmul.mubr.bf16.gmra.mrb[24].mxu1 %v1329_v28 }
 0x6be   : > { %v1968_v29 = vpop.f32.mrb[20].mxu1 }
 0x6bf   : > { %v1444_v30 = vadd.f32 %v1968_v29, %v1662_v11  ;;  %v1435_v31 = vpop.f32.mrb[21].mxu1 }
 0x6c0   : > { %v1436_v32 = vadd.f32 %v1662_v11, %v1435_v31  ;;  %v1969_v33 = vpop.f32.mrb[22].mxu1 }
 0x6c1   : > { %v1468_v35 = vadd.f32 %v2192_v34, %v1444_v30  ;;  %v1447_v36 = vadd.f32 %v1969_v33, %v1662_v11  ;;  %v1438_v37 = vpop.f32.mrb[23].mxu1 }
 0x6c2   : > { %v1466_v39 = vadd.f32 %v2193_v38, %v1436_v32  ;;  %v1439_v40 = vadd.f32 %v1662_v11, %v1438_v37 }
 0x6c3   : > { %1476 = vst [vmem:[%s2817_s20 + $0x10] sm:$0xff] %v1468_v35  ;;  %v1469_v17 = vadd.f32 %v2194_v13, %v1447_v36 }
 0x6c4   : > { %1474 = vst [vmem:[%s2817_s20] sm:$0xff] %v1466_v39  ;;  %v1467_v42 = vadd.f32 %v2195_v41, %v1439_v40 }
 0x6c5   : > { %1477 = vst [vmem:[%s2817_s20 + $0x18] sm:$0xff] %v1469_v17 }
 0x6c6   : > { %1475 = vst [vmem:[%s2817_s20 + $0x8] sm:$0xff] %v1467_v42 }
 0x6c7   : > { %v1972_v18 = vpop.f32.mrb[24].mxu1 }
 0x6c8   : > { %v1460_v20 = vadd.f32 %v1972_v18, %v1662_v11  ;;  %v1451_v43 = vpop.f32.mrb[25].mxu1 }
 0x6c9   : > { %v1452_v44 = vadd.f32 %v1662_v11, %v1451_v43  ;;  %v1973_v45 = vpop.f32.mrb[26].mxu1 }
 0x6ca   : > { %v1472_v25 = vadd.f32 %v2196_v46, %v1460_v20  ;;  %v1463_v47 = vadd.f32 %v1973_v45, %v1662_v11  ;;  %v1454_v27 = vpop.f32.mrb[27].mxu1 }
 0x6cb   : > { %v1470_v49 = vadd.f32 %v2197_v48, %v1452_v44  ;;  %v1455_v50 = vadd.f32 %v1662_v11, %v1454_v27 }
 0x6cc   : > { %1480 = vst [vmem:[%s2817_s20 + $0x30] sm:$0xff] %v1472_v25  ;;  %v1473_v54 = vadd.f32 %v2198_v51, %v1463_v47 }
 0x6cd   : > { %1478 = vst [vmem:[%s2817_s20 + $0x20] sm:$0xff] %v1470_v49  ;;  %v1471_v56 = vadd.f32 %v2199_v55, %v1455_v50 }
 0x6ce   : > { %1481 = vst [vmem:[%s2817_s20 + $0x38] sm:$0xff] %v1473_v54 }
 0x6cf   : > { %1479 = vst [vmem:[%s2817_s20 + $0x28] sm:$0xff] %v1471_v56 }
 0x6d0   : > { %2327 = shalt.err (!%p2324_p0)
}
 0x6d1   : > { %s2328_s19 = scalar_lea.hbm %s2836_s13, 1024  ;;  %s2332_s15 = scalar_lea.hbm %s2926_s11, 2048 }
 0x6d2   : > { %p2329_p4 = scmp.ne.s32.totalorder %s2836_s13, %s2328_s19  ;;  %p2333_p12 = scmp.lt.u32.totalorder %s2836_s13, %s2926_s11 }
 0x6d3   : > { %p2334_p1 = scmp.lt.u32.totalorder %s2332_s15, %s2328_s19  ;;  %p2336_p13 = scmp.lt.u32.totalorder %s2328_s19, %s2836_s13 }
 0x6d4   : > { %p2330_p2 = pnand %p2329_p4, %p2613_p10 }
 0x6d5   : > { %p2335_p11 = por %p2334_p1, %p2333_p12 }
 0x6d6   : > { %p2331_p8 = pneg %p2330_p2 }
 0x6d7   : > { %p2337_p6 = por %p2336_p13, %p2335_p11 }
 0x6d9   : > { %p2338_p3 = pnand %p2337_p6, %p2331_p8 }
 0x6db   : > { %2341 = shalt.err (!%p2338_p3)
}
 0x6dc   : > { %s2420_s22 = smov 128   ;;  %s2421_s9 = smov 8  }
 0x6dd   : > { %2036 = dma.vmem_to_hbm [thread:$0]  (%p2613_p10), %s2828_s21, 1024, %s2836_s13, %s1483_s10, %s2420_s22, %s2420_s22, %s2421_s9  }
 0x6de PF: > { %s2927_s27 = sld [smem:[#allocation18_spill]]  ;;  %s2928_s18 = sld [smem:[#allocation19_spill]] }
 0x6df   : > { %p2930_p7 = scmp.ge.s32.totalorder %s2404_s29, 2 }
 0x6e4   : > { %s1513_s2 = sand.u32 1, %s2927_s27   ;;  %p2929_p5 = scmp.ne.s32.totalorder %s2928_s18, 0 }
 0x6e5   : > { %s1514_s23 = scalar_lea.sflag [#allocation7], %s1513_s2 }
 0x6e6   : > { %p2053_p9 = pnand %p2930_p7, %p2929_p5 }
 0x6e8   : > { %2379 = dma.done.wait (!%p2053_p9), %s1514_s23, 1024  }
 0x6e9   : > { %2381 = vsyncadd (!%p2053_p9), %s1514_s23, 4294966272  ;;  %s25_s29 = sadd.s32 1, %s2404_s29   ;;  %s2931_s24 = smov %s2388_s25 }
 0x6ea   : > { %p22_p0 = scmp.ge.s32.totalorder %s25_s29, 4   ;;  %s2932_s25 = smov %s2392_s26 }
 0x6eb   : > { %s2933_s26 = smov %s2625_s8  ;;  %s2934_s27 = smov %s2400_s28 }
 0x6ec   : > { %s2935_s28 = smov %s2937_s7  ;;  %24 = sbr.rel (!%p22_p0) target bundleno = 11 (0xb), region = 110 }
 0x6f3   :  { %1519 = vsyncpa [#allocation6], 1 }
 0x6f4   :  { %1521 = vsyncpa [#allocation6 + $0x1], 1 }
 0x6f5   :  { %1522 = vsyncpa [#allocation9], 1 }
 0x6f6   :  { %1523 = vsyncpa [#allocation12], 1 }
 0x6f7   :  { %1524 = vsyncpa [#allocation7], 1 }
 0x6f8   :  { %1526 = vsyncpa [#allocation7 + $0x1], 1 }

</bundles_post_ra>
